<compile_context>
chip_gen: v7x
topology: tpu7x:2x2x1
jax: 0.10.0
libtpu: 0.0.40
codegen_flags: <defaults>
</compile_context>

<pallas_src>
import functools

import jax
import jax.numpy as jnp
from jax import lax
from jax.experimental import pallas as pl
from jax.experimental.pallas import tpu as pltpu


def _round_up(n: int, m: int) -> int:
    return ((n + m - 1) // m) * m


def _vmem_limit_bytes() -> int:
    """Generation-aware VMEM limit: ~100 MiB on 128-MiB parts, ~48 MiB on 64-MiB parts."""
    try:
        cap = int(pltpu.get_tpu_info().vmem_capacity_bytes)
    except Exception:
        cap = 64 * 1024 * 1024
    return int(min(max(cap - 16 * 1024 * 1024, 32 * 1024 * 1024), 100 * 1024 * 1024))


def _make_kernel(*, n_head: int, d_k: int, d_v: int,
                 d_true: int, d_pad: int, hv_used: int, hv_pad: int,
                 eps: float = 1e-6):

    def layer_norm(x, gamma, beta):
        # x: (rows, d_pad) f32; padded lanes of x/gamma/beta are zero.
        mu = jnp.sum(x, axis=-1, keepdims=True) * (1.0 / d_true)
        xc = x - mu
        if d_true != d_pad:
            valid = lax.broadcasted_iota(jnp.int32, (1, d_pad), 1) < d_true
            xc = jnp.where(valid, xc, 0.0)           # mask pads out of the variance
        var = jnp.sum(xc * xc, axis=-1, keepdims=True) * (1.0 / d_true)
        # gamma/beta padded lanes are zero -> padded output lanes stay zero.
        return xc * lax.rsqrt(var + eps) * gamma + beta

    def kernel(q_ref, k_ref, v_ref, wq_ref, wk_ref, wv_ref, wo_ref,
               g_ref, b_ref, o_ref, kproj_ref, vproj_ref, oheads_ref):
        gamma = g_ref[...]          # (1, D_pad)
        beta = b_ref[...]           # (1, D_pad)

        # --- K/V-side work is invariant across query tiles: once per batch. ---
        @pl.when(pl.program_id(1) == 0)
        def _():
            kn = layer_norm(k_ref[0], gamma, beta).astype(jnp.bfloat16)   # (Lk, D_pad)
            vn = layer_norm(v_ref[0], gamma, beta).astype(jnp.bfloat16)
            kproj_ref[...] = jnp.dot(kn, wk_ref[...],
                                     preferred_element_type=jnp.float32
                                     ).astype(jnp.bfloat16)               # (Lk, HK_pad)
            vproj_ref[...] = jnp.dot(vn, wv_ref[...],
                                     preferred_element_type=jnp.float32
                                     ).astype(jnp.bfloat16)               # (Lk, HV_pad)

        # --- Q side (per query tile). ---
        residual = q_ref[0]                                               # (TQ, D_pad) f32
        qn = layer_norm(residual, gamma, beta).astype(jnp.bfloat16)
        # 1/sqrt(d_k) is folded into wq in the wrapper; one wide matmul for all heads.
        q_all = jnp.dot(qn, wq_ref[...],
                        preferred_element_type=jnp.float32).astype(jnp.bfloat16)  # (TQ, HK_pad)
        k_all = kproj_ref[...]                                            # (Lk, HK_pad) bf16
        v_all = vproj_ref[...]                                            # (Lk, HV_pad) bf16

        if hv_used < hv_pad:
            # Keep padded lanes clean (scratch is uninitialized; stale NaN * 0 == NaN).
            oheads_ref[...] = jnp.zeros_like(oheads_ref)

        # --- Per-head attention (static loop; small n_head). ---
        for h in range(n_head):
            qh = q_all[:, h * d_k:(h + 1) * d_k]                          # (TQ, d_k)
            kh = k_all[:, h * d_k:(h + 1) * d_k]                          # (Lk, d_k)
            vh = v_all[:, h * d_v:(h + 1) * d_v]                          # (Lk, d_v)

            # Scores: contract last dims directly (no kh.T materialization).
            s = lax.dot_general(qh, kh, (((1,), (1,)), ((), ())),
                                preferred_element_type=jnp.float32)       # (TQ, Lk)

            # Softmax in f32; reciprocal on the EUP instead of a per-element divide.
            m = jnp.max(s, axis=-1, keepdims=True)
            p = jnp.exp(s - m)
            denom = jnp.sum(p, axis=-1, keepdims=True)
            p = (p * pl.reciprocal(denom, approx=True)).astype(jnp.bfloat16)

            oh = jnp.dot(p, vh, preferred_element_type=jnp.float32)       # (TQ, d_v)
            oheads_ref[:, h * d_v:(h + 1) * d_v] = oh                     # f32 scratch slot

        # --- Single fused output projection over all heads. ---
        acc = jnp.dot(oheads_ref[...].astype(jnp.bfloat16), wo_ref[...],
                      preferred_element_type=jnp.float32)                 # (TQ, D_pad)
        o_ref[0] = (acc + residual).astype(o_ref.dtype)

    return kernel


def multi_head_attention4(q, k, v, wq, wk, wv, wo, gamma, beta, *,
                          n_head, d_k, d_v, q_block=None,
                          single_buffer_invariants=True):
    """q: (B, Lq, D), k/v: (B, Lk, D) float32.
    wq/wk/wv: (D, H*d_k|H*d_v), wo: (H*d_v, D) (stored so the math is x @ W).
    gamma/beta: (1, D)."""
    B, Lq, D = q.shape
    Lk = k.shape[1]
    assert v.shape[1] == Lk and k.shape[2] == D and v.shape[2] == D

    HK = n_head * d_k
    HV = n_head * d_v
    D_pad = _round_up(max(D, 128), 128)
    HK_pad = _round_up(max(HK, 128), 128)
    HV_pad = _round_up(max(HV, 128), 128)
    scale = 1.0 / (d_k ** 0.5)

    def pad_last(x, new):
        p = new - x.shape[-1]
        if p == 0:
            return x
        return jnp.pad(x, [(0, 0)] * (x.ndim - 1) + [(0, p)])

    def pad2(w, rows, cols):
        return jnp.zeros((rows, cols), w.dtype).at[:w.shape[0], :w.shape[1]].set(w)

    # Pad activations / LN params to a lane-dense width (padded lanes are zero).
    q_p = pad_last(q, D_pad)
    k_p = pad_last(k, D_pad)
    v_p = pad_last(v, D_pad)
    gamma_p = pad_last(gamma.reshape(1, D), D_pad)
    beta_p = pad_last(beta.reshape(1, D), D_pad)

    # Pad weights; fold 1/sqrt(d_k) into wq; cast to bf16 once at the wrapper.
    wq_p = pad2(wq * scale, D_pad, HK_pad).astype(jnp.bfloat16)
    wk_p = pad2(wk, D_pad, HK_pad).astype(jnp.bfloat16)
    wv_p = pad2(wv, D_pad, HV_pad).astype(jnp.bfloat16)
    wo_p = pad2(wo, HV_pad, D_pad).astype(jnp.bfloat16)

    # Query-tile size: big tiles amortize per-step overhead and feed the MXU taller M.
    if q_block is None:
        q_block = next((c for c in (512, 256, 128) if Lq % c == 0), Lq)
    assert Lq % q_block == 0
    n_q_tiles = Lq // q_block

    kernel = _make_kernel(n_head=n_head, d_k=d_k, d_v=d_v, d_true=D, d_pad=D_pad,
                          hv_used=HV, hv_pad=HV_pad)

    def invariant_spec(block_shape, index_map):
        # Invariant blocks: single-buffer them (no overlap benefit, halves their VMEM).
        if single_buffer_invariants:
            return pl.BlockSpec(block_shape, index_map, pipeline_mode=pl.Buffered(1))
        return pl.BlockSpec(block_shape, index_map)

    q_spec = pl.BlockSpec((1, q_block, D_pad), lambda b, t: (b, t, 0))
    kv_spec = invariant_spec((1, Lk, D_pad), lambda b, t: (b, 0, 0))

    def const_spec(shape):
        return invariant_spec(shape, lambda b, t, _n=len(shape): (0,) * _n)

    out_padded = pl.pallas_call(
        kernel,
        out_shape=jax.ShapeDtypeStruct((B, Lq, D_pad), q.dtype),
        grid_spec=pltpu.PrefetchScalarGridSpec(
            num_scalar_prefetch=0,
            grid=(B, n_q_tiles),
            in_specs=[
                q_spec, kv_spec, kv_spec,
                const_spec(wq_p.shape), const_spec(wk_p.shape),
                const_spec(wv_p.shape), const_spec(wo_p.shape),
                const_spec(gamma_p.shape), const_spec(beta_p.shape),
            ],
            out_specs=q_spec,
            scratch_shapes=[
                pltpu.VMEM((Lk, HK_pad), jnp.bfloat16),   # projected K cache (per batch)
                pltpu.VMEM((Lk, HV_pad), jnp.bfloat16),   # projected V cache (per batch)
                pltpu.VMEM((q_block, HV_pad), jnp.float32),  # per-head outputs -> 1 matmul
            ]),
        compiler_params=pltpu.CompilerParams(
            # t "arbitrary" so the per-batch K/V projection cache is valid across
            # query tiles; B stays "parallel" so both TensorCores are used on v7x.
            dimension_semantics=("parallel", "arbitrary"),
            vmem_limit_bytes=_vmem_limit_bytes(),
        ),
    )(q_p, k_p, v_p, wq_p, wk_p, wv_p, wo_p, gamma_p, beta_p)

    return out_padded[..., :D]


def _reference(q, k, v, wq, wk, wv, wo, gamma, beta, *, n_head, d_k, d_v, eps=1e-6):
    """Pure-JAX f32 reference mirroring the PyTorch forward (eval mode)."""
    B, Lq, D = q.shape

    def ln(x):
        mu = jnp.mean(x, axis=-1, keepdims=True)
        var = jnp.mean((x - mu) ** 2, axis=-1, keepdims=True)
        return (x - mu) / jnp.sqrt(var + eps) * gamma + beta

    residual = q
    qn, kn, vn = ln(q), ln(k), ln(v)
    qp = (qn @ wq).reshape(B, Lq, n_head, d_k).transpose(0, 2, 1, 3)
    kp = (kn @ wk).reshape(B, -1, n_head, d_k).transpose(0, 2, 1, 3)
    vp = (vn @ wv).reshape(B, -1, n_head, d_v).transpose(0, 2, 1, 3)
    attn = jnp.einsum("bhqd,bhkd->bhqk", qp / (d_k ** 0.5), kp)
    attn = jax.nn.softmax(attn, axis=-1)
    out = jnp.einsum("bhqk,bhkd->bhqd", attn, vp)
    out = out.transpose(0, 2, 1, 3).reshape(B, Lq, n_head * d_v)
    return out @ wo + residual


if __name__ == "__main__":
    # Small, deterministic configuration.
    B, L, D = 2, 8, 32
    n_head, d_k, d_v = 4, 8, 8

    key = jax.random.PRNGKey(0)
    kq, kk, kv_, kwq, kwk, kwv, kwo = jax.random.split(key, 7)

    q = jax.random.normal(kq, (B, L, D), jnp.float32)
    k = jax.random.normal(kk, (B, L, D), jnp.float32)
    v = jax.random.normal(kv_, (B, L, D), jnp.float32)

    # Parameters (deterministic init). Stored as (in, out) so the math is x @ W.
    wq = 0.1 * jax.random.normal(kwq, (D, n_head * d_k), jnp.float32)
    wk = 0.1 * jax.random.normal(kwk, (D, n_head * d_k), jnp.float32)
    wv = 0.1 * jax.random.normal(kwv, (D, n_head * d_v), jnp.float32)
    wo = 0.1 * jax.random.normal(kwo, (n_head * d_v, D), jnp.float32)
    gamma = jnp.ones((1, D), jnp.float32)
    beta = jnp.zeros((1, D), jnp.float32)

    args = (q, k, v, wq, wk, wv, wo, gamma, beta)
    base = functools.partial(multi_head_attention4, n_head=n_head, d_k=d_k, d_v=d_v)
    try:
        out = jax.block_until_ready(jax.jit(base)(*args))
    except Exception:
        # Safety net: if this JAX/Mosaic build rejects pl.Buffered(1) on top-level
        # BlockSpecs, fall back to default double-buffering (correctness unchanged).
        fallback = functools.partial(base, single_buffer_invariants=False)
        out = jax.block_until_ready(jax.jit(fallback)(*args))

    ref = _reference(q, k, v, wq, wk, wv, wo, gamma, beta,
                     n_head=n_head, d_k=d_k, d_v=d_v)
    assert out.shape == (B, L, D)
    # Tolerance loosened vs a pure-f32 implementation: bf16 MXU inputs + approx
    # reciprocal (accumulation stays f32, residual path is exact f32) — intentional.
    assert jnp.allclose(out, ref, atol=2e-2, rtol=2e-2), "mismatch vs reference"

    print("KERNEL_OK")
</pallas_src>

<mosaic_0001>
module attributes {stable_mosaic.version = 11 : i64} {
  func.func @kernel(%arg0: i32, %arg1: i32, %arg2: memref<1x8x128xf32, #tpu.memory_space<vmem>>, %arg3: memref<1x8x128xf32, #tpu.memory_space<vmem>>, %arg4: memref<1x8x128xf32, #tpu.memory_space<vmem>>, %arg5: memref<128x128xbf16, #tpu.memory_space<vmem>>, %arg6: memref<128x128xbf16, #tpu.memory_space<vmem>>, %arg7: memref<128x128xbf16, #tpu.memory_space<vmem>>, %arg8: memref<128x128xbf16, #tpu.memory_space<vmem>>, %arg9: memref<1x128xf32, #tpu.memory_space<vmem>>, %arg10: memref<1x128xf32, #tpu.memory_space<vmem>>, %arg11: memref<1x8x128xf32, #tpu.memory_space<vmem>>, %arg12: memref<8x128xbf16, #tpu.memory_space<vmem>>, %arg13: memref<8x128xbf16, #tpu.memory_space<vmem>>, %arg14: memref<8x128xf32, #tpu.memory_space<vmem>>) attributes {dimension_semantics = [#tpu.dimension_semantics<parallel>, #tpu.dimension_semantics<arbitrary>], iteration_bounds = array<i64: 2, 1>, scalar_prefetch = 0 : i64, scratch_operands = 3 : i64, tpu.core_type = #tpu.core_type<tc>, window_params = [{transform_indices = @transform_0, window_bounds = array<i64: 1, 8, 128>}, {pipeline_mode = #tpu.pipeline_mode<synchronous>, transform_indices = @transform_1, window_bounds = array<i64: 1, 8, 128>}, {pipeline_mode = #tpu.pipeline_mode<synchronous>, transform_indices = @transform_2, window_bounds = array<i64: 1, 8, 128>}, {pipeline_mode = #tpu.pipeline_mode<synchronous>, transform_indices = @transform_3, window_bounds = array<i64: 128, 128>}, {pipeline_mode = #tpu.pipeline_mode<synchronous>, transform_indices = @transform_4, window_bounds = array<i64: 128, 128>}, {pipeline_mode = #tpu.pipeline_mode<synchronous>, transform_indices = @transform_5, window_bounds = array<i64: 128, 128>}, {pipeline_mode = #tpu.pipeline_mode<synchronous>, transform_indices = @transform_6, window_bounds = array<i64: 128, 128>}, {pipeline_mode = #tpu.pipeline_mode<synchronous>, transform_indices = @transform_7, window_bounds = array<i64: 1, 128>}, {pipeline_mode = #tpu.pipeline_mode<synchronous>, transform_indices = @transform_8, window_bounds = array<i64: 1, 128>}, {transform_indices = @transform_9, window_bounds = array<i64: 1, 8, 128>}]} {
    %c0 = arith.constant 0 : index
    %c0_0 = arith.constant 0 : index
    %0 = vector.load %arg9[%c0, %c0_0] : memref<1x128xf32, #tpu.memory_space<vmem>>, vector<1x128xf32>
    %c0_1 = arith.constant 0 : index
    %c0_2 = arith.constant 0 : index
    %1 = vector.load %arg10[%c0_1, %c0_2] : memref<1x128xf32, #tpu.memory_space<vmem>>, vector<1x128xf32>
    %c0_i32 = arith.constant 0 : i32
    %2 = arith.cmpi eq, %arg1, %c0_i32 : i32
    %3 = arith.extui %2 : i1 to i32
    %c0_i32_3 = arith.constant 0 : i32
    %4 = arith.cmpi ne, %3, %c0_i32_3 : i32
    scf.if %4 {
      %c0_51 = arith.constant 0 : index
      %c0_52 = arith.constant 0 : index
      %c0_53 = arith.constant 0 : index
      %118 = vector.load %arg3[%c0_51, %c0_52, %c0_53] : memref<1x8x128xf32, #tpu.memory_space<vmem>>, vector<1x8x128xf32>
      %119 = vector.shape_cast %118 : vector<1x8x128xf32> to vector<8x128xf32>
      %cst_54 = arith.constant dense<0.000000e+00> : vector<8xf32>
      %120 = vector.multi_reduction <add>, %119, %cst_54 [1] : vector<8x128xf32> to vector<8xf32>
      %121 = vector.shape_cast %120 : vector<8xf32> to vector<8x1xf32>
      %cst_55 = arith.constant 3.125000e-02 : f32
      %122 = vector.broadcast %cst_55 : f32 to vector<8x1xf32>
      %123 = arith.mulf %121, %122 : vector<8x1xf32>
      %124 = vector.broadcast %123 : vector<8x1xf32> to vector<8x128xf32>
      %125 = arith.subf %119, %124 : vector<8x128xf32>
      %126 = tpu.iota {dimensions = array<i32: 1>} : vector<1x128xi32>
      %c32_i32_56 = arith.constant 32 : i32
      %127 = vector.broadcast %c32_i32_56 : i32 to vector<1x128xi32>
      %128 = arith.cmpi slt, %126, %127 : vector<1x128xi32>
      %cst_57 = arith.constant 0.000000e+00 : f32
      %129 = vector.shape_cast %128 : vector<1x128xi1> to vector<1x128xi1>
      %130 = vector.broadcast %129 : vector<1x128xi1> to vector<8x128xi1>
      %131 = vector.broadcast %cst_57 : f32 to vector<8x128xf32>
      %132 = arith.select %130, %125, %131 : vector<8x128xi1>, vector<8x128xf32>
      %133 = arith.mulf %132, %132 : vector<8x128xf32>
      %cst_58 = arith.constant dense<0.000000e+00> : vector<8xf32>
      %134 = vector.multi_reduction <add>, %133, %cst_58 [1] : vector<8x128xf32> to vector<8xf32>
      %135 = vector.shape_cast %134 : vector<8xf32> to vector<8x1xf32>
      %cst_59 = arith.constant 3.125000e-02 : f32
      %136 = vector.broadcast %cst_59 : f32 to vector<8x1xf32>
      %137 = arith.mulf %135, %136 : vector<8x1xf32>
      %cst_60 = arith.constant 9.99999997E-7 : f32
      %138 = vector.broadcast %cst_60 : f32 to vector<8x1xf32>
      %139 = arith.addf %137, %138 : vector<8x1xf32>
      %140 = math.rsqrt %139 : vector<8x1xf32>
      %141 = vector.broadcast %140 : vector<8x1xf32> to vector<8x128xf32>
      %142 = arith.mulf %132, %141 : vector<8x128xf32>
      %143 = vector.broadcast %0 : vector<1x128xf32> to vector<8x128xf32>
      %144 = arith.mulf %142, %143 : vector<8x128xf32>
      %145 = vector.broadcast %1 : vector<1x128xf32> to vector<8x128xf32>
      %146 = arith.addf %144, %145 : vector<8x128xf32>
      %147 = arith.truncf %146 : vector<8x128xf32> to vector<8x128xbf16>
      %c0_61 = arith.constant 0 : index
      %c0_62 = arith.constant 0 : index
      %c0_63 = arith.constant 0 : index
      %148 = vector.load %arg4[%c0_61, %c0_62, %c0_63] : memref<1x8x128xf32, #tpu.memory_space<vmem>>, vector<1x8x128xf32>
      %149 = vector.shape_cast %148 : vector<1x8x128xf32> to vector<8x128xf32>
      %cst_64 = arith.constant dense<0.000000e+00> : vector<8xf32>
      %150 = vector.multi_reduction <add>, %149, %cst_64 [1] : vector<8x128xf32> to vector<8xf32>
      %151 = vector.shape_cast %150 : vector<8xf32> to vector<8x1xf32>
      %cst_65 = arith.constant 3.125000e-02 : f32
      %152 = vector.broadcast %cst_65 : f32 to vector<8x1xf32>
      %153 = arith.mulf %151, %152 : vector<8x1xf32>
      %154 = vector.broadcast %153 : vector<8x1xf32> to vector<8x128xf32>
      %155 = arith.subf %149, %154 : vector<8x128xf32>
      %156 = tpu.iota {dimensions = array<i32: 1>} : vector<1x128xi32>
      %c32_i32_66 = arith.constant 32 : i32
      %157 = vector.broadcast %c32_i32_66 : i32 to vector<1x128xi32>
      %158 = arith.cmpi slt, %156, %157 : vector<1x128xi32>
      %cst_67 = arith.constant 0.000000e+00 : f32
      %159 = vector.shape_cast %158 : vector<1x128xi1> to vector<1x128xi1>
      %160 = vector.broadcast %159 : vector<1x128xi1> to vector<8x128xi1>
      %161 = vector.broadcast %cst_67 : f32 to vector<8x128xf32>
      %162 = arith.select %160, %155, %161 : vector<8x128xi1>, vector<8x128xf32>
      %163 = arith.mulf %162, %162 : vector<8x128xf32>
      %cst_68 = arith.constant dense<0.000000e+00> : vector<8xf32>
      %164 = vector.multi_reduction <add>, %163, %cst_68 [1] : vector<8x128xf32> to vector<8xf32>
      %165 = vector.shape_cast %164 : vector<8xf32> to vector<8x1xf32>
      %cst_69 = arith.constant 3.125000e-02 : f32
      %166 = vector.broadcast %cst_69 : f32 to vector<8x1xf32>
      %167 = arith.mulf %165, %166 : vector<8x1xf32>
      %cst_70 = arith.constant 9.99999997E-7 : f32
      %168 = vector.broadcast %cst_70 : f32 to vector<8x1xf32>
      %169 = arith.addf %167, %168 : vector<8x1xf32>
      %170 = math.rsqrt %169 : vector<8x1xf32>
      %171 = vector.broadcast %170 : vector<8x1xf32> to vector<8x128xf32>
      %172 = arith.mulf %162, %171 : vector<8x128xf32>
      %173 = vector.broadcast %0 : vector<1x128xf32> to vector<8x128xf32>
      %174 = arith.mulf %172, %173 : vector<8x128xf32>
      %175 = vector.broadcast %1 : vector<1x128xf32> to vector<8x128xf32>
      %176 = arith.addf %174, %175 : vector<8x128xf32>
      %177 = arith.truncf %176 : vector<8x128xf32> to vector<8x128xbf16>
      %c0_71 = arith.constant 0 : index
      %c0_72 = arith.constant 0 : index
      %178 = vector.load %arg6[%c0_71, %c0_72] : memref<128x128xbf16, #tpu.memory_space<vmem>>, vector<128x128xbf16>
      %cst_73 = arith.constant dense<0.000000e+00> : vector<8x128xf32>
      %179 = tpu.matmul %147, %178, %cst_73 {dimension_numbers = #tpu.dot_dimension_numbers<[1], [0], [0], [1], [0, 0, 1, 1], [], []>} : vector<8x128xbf16>, vector<128x128xbf16>, vector<8x128xf32> -> vector<8x128xf32>
      %180 = arith.truncf %179 : vector<8x128xf32> to vector<8x128xbf16>
      %c0_74 = arith.constant 0 : index
      %c0_75 = arith.constant 0 : index
      %181 = vector.load %arg12[%c0_74, %c0_75] : memref<8x128xbf16, #tpu.memory_space<vmem>>, vector<8x128xbf16>
      tpu.vector_store %arg12[%c0_74, %c0_75], %180 {strides = array<i32>} : memref<8x128xbf16, #tpu.memory_space<vmem>>, vector<8x128xbf16>,
      %c0_76 = arith.constant 0 : index
      %c0_77 = arith.constant 0 : index
      %182 = vector.load %arg7[%c0_76, %c0_77] : memref<128x128xbf16, #tpu.memory_space<vmem>>, vector<128x128xbf16>
      %cst_78 = arith.constant dense<0.000000e+00> : vector<8x128xf32>
      %183 = tpu.matmul %177, %182, %cst_78 {dimension_numbers = #tpu.dot_dimension_numbers<[1], [0], [0], [1], [0, 0, 1, 1], [], []>} : vector<8x128xbf16>, vector<128x128xbf16>, vector<8x128xf32> -> vector<8x128xf32>
      %184 = arith.truncf %183 : vector<8x128xf32> to vector<8x128xbf16>
      %c0_79 = arith.constant 0 : index
      %c0_80 = arith.constant 0 : index
      %185 = vector.load %arg13[%c0_79, %c0_80] : memref<8x128xbf16, #tpu.memory_space<vmem>>, vector<8x128xbf16>
      tpu.vector_store %arg13[%c0_79, %c0_80], %184 {strides = array<i32>} : memref<8x128xbf16, #tpu.memory_space<vmem>>, vector<8x128xbf16>,
    } else {
    }
    %c0_4 = arith.constant 0 : index
    %c0_5 = arith.constant 0 : index
    %c0_6 = arith.constant 0 : index
    %5 = vector.load %arg2[%c0_4, %c0_5, %c0_6] : memref<1x8x128xf32, #tpu.memory_space<vmem>>, vector<1x8x128xf32>
    %6 = vector.shape_cast %5 : vector<1x8x128xf32> to vector<8x128xf32>
    %cst = arith.constant dense<0.000000e+00> : vector<8xf32>
    %7 = vector.multi_reduction <add>, %6, %cst [1] : vector<8x128xf32> to vector<8xf32>
    %8 = vector.shape_cast %7 : vector<8xf32> to vector<8x1xf32>
    %cst_7 = arith.constant 3.125000e-02 : f32
    %9 = vector.broadcast %cst_7 : f32 to vector<8x1xf32>
    %10 = arith.mulf %8, %9 : vector<8x1xf32>
    %11 = vector.broadcast %10 : vector<8x1xf32> to vector<8x128xf32>
    %12 = arith.subf %6, %11 : vector<8x128xf32>
    %13 = tpu.iota {dimensions = array<i32: 1>} : vector<1x128xi32>
    %c32_i32 = arith.constant 32 : i32
    %14 = vector.broadcast %c32_i32 : i32 to vector<1x128xi32>
    %15 = arith.cmpi slt, %13, %14 : vector<1x128xi32>
    %cst_8 = arith.constant 0.000000e+00 : f32
    %16 = vector.shape_cast %15 : vector<1x128xi1> to vector<1x128xi1>
    %17 = vector.broadcast %16 : vector<1x128xi1> to vector<8x128xi1>
    %18 = vector.broadcast %cst_8 : f32 to vector<8x128xf32>
    %19 = arith.select %17, %12, %18 : vector<8x128xi1>, vector<8x128xf32>
    %20 = arith.mulf %19, %19 : vector<8x128xf32>
    %cst_9 = arith.constant dense<0.000000e+00> : vector<8xf32>
    %21 = vector.multi_reduction <add>, %20, %cst_9 [1] : vector<8x128xf32> to vector<8xf32>
    %22 = vector.shape_cast %21 : vector<8xf32> to vector<8x1xf32>
    %cst_10 = arith.constant 3.125000e-02 : f32
    %23 = vector.broadcast %cst_10 : f32 to vector<8x1xf32>
    %24 = arith.mulf %22, %23 : vector<8x1xf32>
    %cst_11 = arith.constant 9.99999997E-7 : f32
    %25 = vector.broadcast %cst_11 : f32 to vector<8x1xf32>
    %26 = arith.addf %24, %25 : vector<8x1xf32>
    %27 = math.rsqrt %26 : vector<8x1xf32>
    %28 = vector.broadcast %27 : vector<8x1xf32> to vector<8x128xf32>
    %29 = arith.mulf %19, %28 : vector<8x128xf32>
    %30 = vector.broadcast %0 : vector<1x128xf32> to vector<8x128xf32>
    %31 = arith.mulf %29, %30 : vector<8x128xf32>
    %32 = vector.broadcast %1 : vector<1x128xf32> to vector<8x128xf32>
    %33 = arith.addf %31, %32 : vector<8x128xf32>
    %34 = arith.truncf %33 : vector<8x128xf32> to vector<8x128xbf16>
    %c0_12 = arith.constant 0 : index
    %c0_13 = arith.constant 0 : index
    %35 = vector.load %arg5[%c0_12, %c0_13] : memref<128x128xbf16, #tpu.memory_space<vmem>>, vector<128x128xbf16>
    %cst_14 = arith.constant dense<0.000000e+00> : vector<8x128xf32>
    %36 = tpu.matmul %34, %35, %cst_14 {dimension_numbers = #tpu.dot_dimension_numbers<[1], [0], [0], [1], [0, 0, 1, 1], [], []>} : vector<8x128xbf16>, vector<128x128xbf16>, vector<8x128xf32> -> vector<8x128xf32>
    %37 = arith.truncf %36 : vector<8x128xf32> to vector<8x128xbf16>
    %c0_15 = arith.constant 0 : index
    %c0_16 = arith.constant 0 : index
    %38 = vector.load %arg12[%c0_15, %c0_16] : memref<8x128xbf16, #tpu.memory_space<vmem>>, vector<8x128xbf16>
    %c0_17 = arith.constant 0 : index
    %c0_18 = arith.constant 0 : index
    %39 = vector.load %arg13[%c0_17, %c0_18] : memref<8x128xbf16, #tpu.memory_space<vmem>>, vector<8x128xbf16>
    %cst_19 = arith.constant 0.000000e+00 : f32
    %40 = vector.broadcast %cst_19 : f32 to vector<8x128xf32>
    %c0_20 = arith.constant 0 : index
    %c0_21 = arith.constant 0 : index
    %41 = vector.load %arg14[%c0_20, %c0_21] : memref<8x128xf32, #tpu.memory_space<vmem>>, vector<8x128xf32>
    tpu.vector_store %arg14[%c0_20, %c0_21], %40 {strides = array<i32>} : memref<8x128xf32, #tpu.memory_space<vmem>>, vector<8x128xf32>,
    %42 = vector.extract_strided_slice %37 {offsets = [0, 0], sizes = [8, 8], strides = [1, 1]} : vector<8x128xbf16> to vector<8x8xbf16>
    %43 = vector.extract_strided_slice %38 {offsets = [0, 0], sizes = [8, 8], strides = [1, 1]} : vector<8x128xbf16> to vector<8x8xbf16>
    %44 = vector.extract_strided_slice %39 {offsets = [0, 0], sizes = [8, 8], strides = [1, 1]} : vector<8x128xbf16> to vector<8x8xbf16>
    %cst_22 = arith.constant dense<0.000000e+00> : vector<8x8xf32>
    %45 = tpu.matmul %42, %43, %cst_22 {dimension_numbers = #tpu.dot_dimension_numbers<[1], [1], [0], [0], [0, 0, 1, 0], [], []>} : vector<8x8xbf16>, vector<8x8xbf16>, vector<8x8xf32> -> vector<8x8xf32>
    %cst_23 = arith.constant dense<0xFF800000> : vector<8xf32>
    %46 = vector.multi_reduction <maximumf>, %45, %cst_23 [1] : vector<8x8xf32> to vector<8xf32>
    %47 = vector.shape_cast %46 : vector<8xf32> to vector<8x1xf32>
    %48 = vector.broadcast %47 : vector<8x1xf32> to vector<8x8xf32>
    %49 = arith.subf %45, %48 : vector<8x8xf32>
    %50 = math.exp %49 : vector<8x8xf32>
    %cst_24 = arith.constant dense<0.000000e+00> : vector<8xf32>
    %51 = vector.multi_reduction <add>, %50, %cst_24 [1] : vector<8x8xf32> to vector<8xf32>
    %52 = vector.shape_cast %51 : vector<8xf32> to vector<8x1xf32>
    %53 = tpu.reciprocal %52 {approx = true} : vector<8x1xf32> -> vector<8x1xf32>
    %54 = vector.broadcast %53 : vector<8x1xf32> to vector<8x8xf32>
    %55 = arith.mulf %50, %54 : vector<8x8xf32>
    %56 = arith.truncf %55 : vector<8x8xf32> to vector<8x8xbf16>
    %cst_25 = arith.constant dense<0.000000e+00> : vector<8x8xf32>
    %57 = tpu.matmul %56, %44, %cst_25 {dimension_numbers = #tpu.dot_dimension_numbers<[1], [0], [0], [1], [0, 0, 1, 1], [], []>} : vector<8x8xbf16>, vector<8x8xbf16>, vector<8x8xf32> -> vector<8x8xf32>
    %c0_26 = arith.constant 0 : index
    %c0_27 = arith.constant 0 : index
    %58 = vector.load %arg14[%c0_26, %c0_27] : memref<8x128xf32, #tpu.memory_space<vmem>>, vector<8x8xf32>
    tpu.vector_store %arg14[%c0_26, %c0_27], %57 {strides = array<i32>} : memref<8x128xf32, #tpu.memory_space<vmem>>, vector<8x8xf32>,
    %59 = vector.extract_strided_slice %37 {offsets = [0, 8], sizes = [8, 8], strides = [1, 1]} : vector<8x128xbf16> to vector<8x8xbf16>
    %60 = vector.extract_strided_slice %38 {offsets = [0, 8], sizes = [8, 8], strides = [1, 1]} : vector<8x128xbf16> to vector<8x8xbf16>
    %61 = vector.extract_strided_slice %39 {offsets = [0, 8], sizes = [8, 8], strides = [1, 1]} : vector<8x128xbf16> to vector<8x8xbf16>
    %cst_28 = arith.constant dense<0.000000e+00> : vector<8x8xf32>
    %62 = tpu.matmul %59, %60, %cst_28 {dimension_numbers = #tpu.dot_dimension_numbers<[1], [1], [0], [0], [0, 0, 1, 0], [], []>} : vector<8x8xbf16>, vector<8x8xbf16>, vector<8x8xf32> -> vector<8x8xf32>
    %cst_29 = arith.constant dense<0xFF800000> : vector<8xf32>
    %63 = vector.multi_reduction <maximumf>, %62, %cst_29 [1] : vector<8x8xf32> to vector<8xf32>
    %64 = vector.shape_cast %63 : vector<8xf32> to vector<8x1xf32>
    %65 = vector.broadcast %64 : vector<8x1xf32> to vector<8x8xf32>
    %66 = arith.subf %62, %65 : vector<8x8xf32>
    %67 = math.exp %66 : vector<8x8xf32>
    %cst_30 = arith.constant dense<0.000000e+00> : vector<8xf32>
    %68 = vector.multi_reduction <add>, %67, %cst_30 [1] : vector<8x8xf32> to vector<8xf32>
    %69 = vector.shape_cast %68 : vector<8xf32> to vector<8x1xf32>
    %70 = tpu.reciprocal %69 {approx = true} : vector<8x1xf32> -> vector<8x1xf32>
    %71 = vector.broadcast %70 : vector<8x1xf32> to vector<8x8xf32>
    %72 = arith.mulf %67, %71 : vector<8x8xf32>
    %73 = arith.truncf %72 : vector<8x8xf32> to vector<8x8xbf16>
    %cst_31 = arith.constant dense<0.000000e+00> : vector<8x8xf32>
    %74 = tpu.matmul %73, %61, %cst_31 {dimension_numbers = #tpu.dot_dimension_numbers<[1], [0], [0], [1], [0, 0, 1, 1], [], []>} : vector<8x8xbf16>, vector<8x8xbf16>, vector<8x8xf32> -> vector<8x8xf32>
    %c0_32 = arith.constant 0 : index
    %c8 = arith.constant 8 : index
    %75 = vector.load %arg14[%c0_32, %c8] : memref<8x128xf32, #tpu.memory_space<vmem>>, vector<8x8xf32>
    tpu.vector_store %arg14[%c0_32, %c8], %74 {strides = array<i32>} : memref<8x128xf32, #tpu.memory_space<vmem>>, vector<8x8xf32>,
    %76 = vector.extract_strided_slice %37 {offsets = [0, 16], sizes = [8, 8], strides = [1, 1]} : vector<8x128xbf16> to vector<8x8xbf16>
    %77 = vector.extract_strided_slice %38 {offsets = [0, 16], sizes = [8, 8], strides = [1, 1]} : vector<8x128xbf16> to vector<8x8xbf16>
    %78 = vector.extract_strided_slice %39 {offsets = [0, 16], sizes = [8, 8], strides = [1, 1]} : vector<8x128xbf16> to vector<8x8xbf16>
    %cst_33 = arith.constant dense<0.000000e+00> : vector<8x8xf32>
    %79 = tpu.matmul %76, %77, %cst_33 {dimension_numbers = #tpu.dot_dimension_numbers<[1], [1], [0], [0], [0, 0, 1, 0], [], []>} : vector<8x8xbf16>, vector<8x8xbf16>, vector<8x8xf32> -> vector<8x8xf32>
    %cst_34 = arith.constant dense<0xFF800000> : vector<8xf32>
    %80 = vector.multi_reduction <maximumf>, %79, %cst_34 [1] : vector<8x8xf32> to vector<8xf32>
    %81 = vector.shape_cast %80 : vector<8xf32> to vector<8x1xf32>
    %82 = vector.broadcast %81 : vector<8x1xf32> to vector<8x8xf32>
    %83 = arith.subf %79, %82 : vector<8x8xf32>
    %84 = math.exp %83 : vector<8x8xf32>
    %cst_35 = arith.constant dense<0.000000e+00> : vector<8xf32>
    %85 = vector.multi_reduction <add>, %84, %cst_35 [1] : vector<8x8xf32> to vector<8xf32>
    %86 = vector.shape_cast %85 : vector<8xf32> to vector<8x1xf32>
    %87 = tpu.reciprocal %86 {approx = true} : vector<8x1xf32> -> vector<8x1xf32>
    %88 = vector.broadcast %87 : vector<8x1xf32> to vector<8x8xf32>
    %89 = arith.mulf %84, %88 : vector<8x8xf32>
    %90 = arith.truncf %89 : vector<8x8xf32> to vector<8x8xbf16>
    %cst_36 = arith.constant dense<0.000000e+00> : vector<8x8xf32>
    %91 = tpu.matmul %90, %78, %cst_36 {dimension_numbers = #tpu.dot_dimension_numbers<[1], [0], [0], [1], [0, 0, 1, 1], [], []>} : vector<8x8xbf16>, vector<8x8xbf16>, vector<8x8xf32> -> vector<8x8xf32>
    %c0_37 = arith.constant 0 : index
    %c16 = arith.constant 16 : index
    %92 = vector.load %arg14[%c0_37, %c16] : memref<8x128xf32, #tpu.memory_space<vmem>>, vector<8x8xf32>
    tpu.vector_store %arg14[%c0_37, %c16], %91 {strides = array<i32>} : memref<8x128xf32, #tpu.memory_space<vmem>>, vector<8x8xf32>,
    %93 = vector.extract_strided_slice %37 {offsets = [0, 24], sizes = [8, 8], strides = [1, 1]} : vector<8x128xbf16> to vector<8x8xbf16>
    %94 = vector.extract_strided_slice %38 {offsets = [0, 24], sizes = [8, 8], strides = [1, 1]} : vector<8x128xbf16> to vector<8x8xbf16>
    %95 = vector.extract_strided_slice %39 {offsets = [0, 24], sizes = [8, 8], strides = [1, 1]} : vector<8x128xbf16> to vector<8x8xbf16>
    %cst_38 = arith.constant dense<0.000000e+00> : vector<8x8xf32>
    %96 = tpu.matmul %93, %94, %cst_38 {dimension_numbers = #tpu.dot_dimension_numbers<[1], [1], [0], [0], [0, 0, 1, 0], [], []>} : vector<8x8xbf16>, vector<8x8xbf16>, vector<8x8xf32> -> vector<8x8xf32>
    %cst_39 = arith.constant dense<0xFF800000> : vector<8xf32>
    %97 = vector.multi_reduction <maximumf>, %96, %cst_39 [1] : vector<8x8xf32> to vector<8xf32>
    %98 = vector.shape_cast %97 : vector<8xf32> to vector<8x1xf32>
    %99 = vector.broadcast %98 : vector<8x1xf32> to vector<8x8xf32>
    %100 = arith.subf %96, %99 : vector<8x8xf32>
    %101 = math.exp %100 : vector<8x8xf32>
    %cst_40 = arith.constant dense<0.000000e+00> : vector<8xf32>
    %102 = vector.multi_reduction <add>, %101, %cst_40 [1] : vector<8x8xf32> to vector<8xf32>
    %103 = vector.shape_cast %102 : vector<8xf32> to vector<8x1xf32>
    %104 = tpu.reciprocal %103 {approx = true} : vector<8x1xf32> -> vector<8x1xf32>
    %105 = vector.broadcast %104 : vector<8x1xf32> to vector<8x8xf32>
    %106 = arith.mulf %101, %105 : vector<8x8xf32>
    %107 = arith.truncf %106 : vector<8x8xf32> to vector<8x8xbf16>
    %cst_41 = arith.constant dense<0.000000e+00> : vector<8x8xf32>
    %108 = tpu.matmul %107, %95, %cst_41 {dimension_numbers = #tpu.dot_dimension_numbers<[1], [0], [0], [1], [0, 0, 1, 1], [], []>} : vector<8x8xbf16>, vector<8x8xbf16>, vector<8x8xf32> -> vector<8x8xf32>
    %c0_42 = arith.constant 0 : index
    %c24 = arith.constant 24 : index
    %109 = vector.load %arg14[%c0_42, %c24] : memref<8x128xf32, #tpu.memory_space<vmem>>, vector<8x8xf32>
    tpu.vector_store %arg14[%c0_42, %c24], %108 {strides = array<i32>} : memref<8x128xf32, #tpu.memory_space<vmem>>, vector<8x8xf32>,
    %c0_43 = arith.constant 0 : index
    %c0_44 = arith.constant 0 : index
    %110 = vector.load %arg14[%c0_43, %c0_44] : memref<8x128xf32, #tpu.memory_space<vmem>>, vector<8x128xf32>
    %111 = arith.truncf %110 : vector<8x128xf32> to vector<8x128xbf16>
    %c0_45 = arith.constant 0 : index
    %c0_46 = arith.constant 0 : index
    %112 = vector.load %arg8[%c0_45, %c0_46] : memref<128x128xbf16, #tpu.memory_space<vmem>>, vector<128x128xbf16>
    %cst_47 = arith.constant dense<0.000000e+00> : vector<8x128xf32>
    %113 = tpu.matmul %111, %112, %cst_47 {dimension_numbers = #tpu.dot_dimension_numbers<[1], [0], [0], [1], [0, 0, 1, 1], [], []>} : vector<8x128xbf16>, vector<128x128xbf16>, vector<8x128xf32> -> vector<8x128xf32>
    %114 = arith.addf %113, %6 : vector<8x128xf32>
    %c0_48 = arith.constant 0 : index
    %c0_49 = arith.constant 0 : index
    %c0_50 = arith.constant 0 : index
    %115 = vector.load %arg11[%c0_48, %c0_49, %c0_50] : memref<1x8x128xf32, #tpu.memory_space<vmem>>, vector<1x8x128xf32>
    %116 = vector.shape_cast %115 : vector<1x8x128xf32> to vector<8x128xf32>
    %117 = vector.shape_cast %114 : vector<8x128xf32> to vector<1x8x128xf32>
    tpu.vector_store %arg11[%c0_48, %c0_49, %c0_50], %117 {strides = array<i32>} : memref<1x8x128xf32, #tpu.memory_space<vmem>>, vector<1x8x128xf32>,
    return
  }
  func.func @transform_0(%arg0: i32, %arg1: i32) -> (i32, i32, i32) {
    %c0_i32 = arith.constant 0 : i32
    %c0_i32_0 = arith.constant 0 : i32
    return %arg0, %arg1, %c0_i32 : i32, i32, i32
  }
  func.func @transform_1(%arg0: i32, %arg1: i32) -> (i32, i32, i32) {
    %c0_i32 = arith.constant 0 : i32
    %c0_i32_0 = arith.constant 0 : i32
    %c0_i32_1 = arith.constant 0 : i32
    return %arg0, %c0_i32, %c0_i32_0 : i32, i32, i32
  }
  func.func @transform_2(%arg0: i32, %arg1: i32) -> (i32, i32, i32) {
    %c0_i32 = arith.constant 0 : i32
    %c0_i32_0 = arith.constant 0 : i32
    %c0_i32_1 = arith.constant 0 : i32
    return %arg0, %c0_i32, %c0_i32_0 : i32, i32, i32
  }
  func.func @transform_3(%arg0: i32, %arg1: i32) -> (i32, i32) {
    %c0_i32 = arith.constant 0 : i32
    %c0_i32_0 = arith.constant 0 : i32
    %c0_i32_1 = arith.constant 0 : i32
    return %c0_i32, %c0_i32_0 : i32, i32
  }
  func.func @transform_4(%arg0: i32, %arg1: i32) -> (i32, i32) {
    %c0_i32 = arith.constant 0 : i32
    %c0_i32_0 = arith.constant 0 : i32
    %c0_i32_1 = arith.constant 0 : i32
    return %c0_i32, %c0_i32_0 : i32, i32
  }
  func.func @transform_5(%arg0: i32, %arg1: i32) -> (i32, i32) {
    %c0_i32 = arith.constant 0 : i32
    %c0_i32_0 = arith.constant 0 : i32
    %c0_i32_1 = arith.constant 0 : i32
    return %c0_i32, %c0_i32_0 : i32, i32
  }
  func.func @transform_6(%arg0: i32, %arg1: i32) -> (i32, i32) {
    %c0_i32 = arith.constant 0 : i32
    %c0_i32_0 = arith.constant 0 : i32
    %c0_i32_1 = arith.constant 0 : i32
    return %c0_i32, %c0_i32_0 : i32, i32
  }
  func.func @transform_7(%arg0: i32, %arg1: i32) -> (i32, i32) {
    %c0_i32 = arith.constant 0 : i32
    %c0_i32_0 = arith.constant 0 : i32
    %c0_i32_1 = arith.constant 0 : i32
    return %c0_i32, %c0_i32_0 : i32, i32
  }
  func.func @transform_8(%arg0: i32, %arg1: i32) -> (i32, i32) {
    %c0_i32 = arith.constant 0 : i32
    %c0_i32_0 = arith.constant 0 : i32
    %c0_i32_1 = arith.constant 0 : i32
    return %c0_i32, %c0_i32_0 : i32, i32
  }
  func.func @transform_9(%arg0: i32, %arg1: i32) -> (i32, i32, i32) {
    %c0_i32 = arith.constant 0 : i32
    %c0_i32_0 = arith.constant 0 : i32
    return %arg0, %arg1, %c0_i32 : i32, i32, i32
  }
}

module attributes {stable_mosaic.version = 11 : i64} {
  func.func @kernel(%arg0: i32, %arg1: i32, %arg2: memref<1x8x128xf32, #tpu.memory_space<vmem>>, %arg3: memref<1x8x128xf32, #tpu.memory_space<vmem>>, %arg4: memref<1x8x128xf32, #tpu.memory_space<vmem>>, %arg5: memref<128x128xbf16, #tpu.memory_space<vmem>>, %arg6: memref<128x128xbf16, #tpu.memory_space<vmem>>, %arg7: memref<128x128xbf16, #tpu.memory_space<vmem>>, %arg8: memref<128x128xbf16, #tpu.memory_space<vmem>>, %arg9: memref<1x128xf32, #tpu.memory_space<vmem>>, %arg10: memref<1x128xf32, #tpu.memory_space<vmem>>, %arg11: memref<1x8x128xf32, #tpu.memory_space<vmem>>, %arg12: memref<8x128xbf16, #tpu.memory_space<vmem>>, %arg13: memref<8x128xbf16, #tpu.memory_space<vmem>>, %arg14: memref<8x128xf32, #tpu.memory_space<vmem>>) attributes {dimension_semantics = [#tpu.dimension_semantics<parallel>, #tpu.dimension_semantics<arbitrary>], iteration_bounds = array<i64: 2, 1>, scalar_prefetch = 0 : i64, scratch_operands = 3 : i64, tpu.core_type = #tpu.core_type<tc>, window_params = [{transform_indices = @transform_0, window_bounds = array<i64: 1, 8, 128>}, {transform_indices = @transform_1, window_bounds = array<i64: 1, 8, 128>}, {transform_indices = @transform_2, window_bounds = array<i64: 1, 8, 128>}, {pipeline_mode = #tpu.pipeline_mode<synchronous>, transform_indices = @transform_3, window_bounds = array<i64: 128, 128>}, {pipeline_mode = #tpu.pipeline_mode<synchronous>, transform_indices = @transform_4, window_bounds = array<i64: 128, 128>}, {pipeline_mode = #tpu.pipeline_mode<synchronous>, transform_indices = @transform_5, window_bounds = array<i64: 128, 128>}, {pipeline_mode = #tpu.pipeline_mode<synchronous>, transform_indices = @transform_6, window_bounds = array<i64: 128, 128>}, {pipeline_mode = #tpu.pipeline_mode<synchronous>, transform_indices = @transform_7, window_bounds = array<i64: 1, 128>}, {pipeline_mode = #tpu.pipeline_mode<synchronous>, transform_indices = @transform_8, window_bounds = array<i64: 1, 128>}, {transform_indices = @transform_9, window_bounds = array<i64: 1, 8, 128>}]} {
    %c0 = arith.constant 0 : index
    %c0_0 = arith.constant 0 : index
    %0 = vector.load %arg9[%c0, %c0_0] : memref<1x128xf32, #tpu.memory_space<vmem>>, vector<1x128xf32>
    %c0_1 = arith.constant 0 : index
    %c0_2 = arith.constant 0 : index
    %1 = vector.load %arg10[%c0_1, %c0_2] : memref<1x128xf32, #tpu.memory_space<vmem>>, vector<1x128xf32>
    %c0_i32 = arith.constant 0 : i32
    %2 = arith.cmpi eq, %arg1, %c0_i32 : i32
    %3 = arith.extui %2 : i1 to i32
    %c0_i32_3 = arith.constant 0 : i32
    %4 = arith.cmpi ne, %3, %c0_i32_3 : i32
    scf.if %4 {
      %c0_51 = arith.constant 0 : index
      %c0_52 = arith.constant 0 : index
      %c0_53 = arith.constant 0 : index
      %118 = vector.load %arg3[%c0_51, %c0_52, %c0_53] : memref<1x8x128xf32, #tpu.memory_space<vmem>>, vector<1x8x128xf32>
      %119 = vector.shape_cast %118 : vector<1x8x128xf32> to vector<8x128xf32>
      %cst_54 = arith.constant dense<0.000000e+00> : vector<8xf32>
      %120 = vector.multi_reduction <add>, %119, %cst_54 [1] : vector<8x128xf32> to vector<8xf32>
      %121 = vector.shape_cast %120 : vector<8xf32> to vector<8x1xf32>
      %cst_55 = arith.constant 3.125000e-02 : f32
      %122 = vector.broadcast %cst_55 : f32 to vector<8x1xf32>
      %123 = arith.mulf %121, %122 : vector<8x1xf32>
      %124 = vector.broadcast %123 : vector<8x1xf32> to vector<8x128xf32>
      %125 = arith.subf %119, %124 : vector<8x128xf32>
      %126 = tpu.iota {dimensions = array<i32: 1>} : vector<1x128xi32>
      %c32_i32_56 = arith.constant 32 : i32
      %127 = vector.broadcast %c32_i32_56 : i32 to vector<1x128xi32>
      %128 = arith.cmpi slt, %126, %127 : vector<1x128xi32>
      %cst_57 = arith.constant 0.000000e+00 : f32
      %129 = vector.shape_cast %128 : vector<1x128xi1> to vector<1x128xi1>
      %130 = vector.broadcast %129 : vector<1x128xi1> to vector<8x128xi1>
      %131 = vector.broadcast %cst_57 : f32 to vector<8x128xf32>
      %132 = arith.select %130, %125, %131 : vector<8x128xi1>, vector<8x128xf32>
      %133 = arith.mulf %132, %132 : vector<8x128xf32>
      %cst_58 = arith.constant dense<0.000000e+00> : vector<8xf32>
      %134 = vector.multi_reduction <add>, %133, %cst_58 [1] : vector<8x128xf32> to vector<8xf32>
      %135 = vector.shape_cast %134 : vector<8xf32> to vector<8x1xf32>
      %cst_59 = arith.constant 3.125000e-02 : f32
      %136 = vector.broadcast %cst_59 : f32 to vector<8x1xf32>
      %137 = arith.mulf %135, %136 : vector<8x1xf32>
      %cst_60 = arith.constant 9.99999997E-7 : f32
      %138 = vector.broadcast %cst_60 : f32 to vector<8x1xf32>
      %139 = arith.addf %137, %138 : vector<8x1xf32>
      %140 = math.rsqrt %139 : vector<8x1xf32>
      %141 = vector.broadcast %140 : vector<8x1xf32> to vector<8x128xf32>
      %142 = arith.mulf %132, %141 : vector<8x128xf32>
      %143 = vector.broadcast %0 : vector<1x128xf32> to vector<8x128xf32>
      %144 = arith.mulf %142, %143 : vector<8x128xf32>
      %145 = vector.broadcast %1 : vector<1x128xf32> to vector<8x128xf32>
      %146 = arith.addf %144, %145 : vector<8x128xf32>
      %147 = arith.truncf %146 : vector<8x128xf32> to vector<8x128xbf16>
      %c0_61 = arith.constant 0 : index
      %c0_62 = arith.constant 0 : index
      %c0_63 = arith.constant 0 : index
      %148 = vector.load %arg4[%c0_61, %c0_62, %c0_63] : memref<1x8x128xf32, #tpu.memory_space<vmem>>, vector<1x8x128xf32>
      %149 = vector.shape_cast %148 : vector<1x8x128xf32> to vector<8x128xf32>
      %cst_64 = arith.constant dense<0.000000e+00> : vector<8xf32>
      %150 = vector.multi_reduction <add>, %149, %cst_64 [1] : vector<8x128xf32> to vector<8xf32>
      %151 = vector.shape_cast %150 : vector<8xf32> to vector<8x1xf32>
      %cst_65 = arith.constant 3.125000e-02 : f32
      %152 = vector.broadcast %cst_65 : f32 to vector<8x1xf32>
      %153 = arith.mulf %151, %152 : vector<8x1xf32>
      %154 = vector.broadcast %153 : vector<8x1xf32> to vector<8x128xf32>
      %155 = arith.subf %149, %154 : vector<8x128xf32>
      %156 = tpu.iota {dimensions = array<i32: 1>} : vector<1x128xi32>
      %c32_i32_66 = arith.constant 32 : i32
      %157 = vector.broadcast %c32_i32_66 : i32 to vector<1x128xi32>
      %158 = arith.cmpi slt, %156, %157 : vector<1x128xi32>
      %cst_67 = arith.constant 0.000000e+00 : f32
      %159 = vector.shape_cast %158 : vector<1x128xi1> to vector<1x128xi1>
      %160 = vector.broadcast %159 : vector<1x128xi1> to vector<8x128xi1>
      %161 = vector.broadcast %cst_67 : f32 to vector<8x128xf32>
      %162 = arith.select %160, %155, %161 : vector<8x128xi1>, vector<8x128xf32>
      %163 = arith.mulf %162, %162 : vector<8x128xf32>
      %cst_68 = arith.constant dense<0.000000e+00> : vector<8xf32>
      %164 = vector.multi_reduction <add>, %163, %cst_68 [1] : vector<8x128xf32> to vector<8xf32>
      %165 = vector.shape_cast %164 : vector<8xf32> to vector<8x1xf32>
      %cst_69 = arith.constant 3.125000e-02 : f32
      %166 = vector.broadcast %cst_69 : f32 to vector<8x1xf32>
      %167 = arith.mulf %165, %166 : vector<8x1xf32>
      %cst_70 = arith.constant 9.99999997E-7 : f32
      %168 = vector.broadcast %cst_70 : f32 to vector<8x1xf32>
      %169 = arith.addf %167, %168 : vector<8x1xf32>
      %170 = math.rsqrt %169 : vector<8x1xf32>
      %171 = vector.broadcast %170 : vector<8x1xf32> to vector<8x128xf32>
      %172 = arith.mulf %162, %171 : vector<8x128xf32>
      %173 = vector.broadcast %0 : vector<1x128xf32> to vector<8x128xf32>
      %174 = arith.mulf %172, %173 : vector<8x128xf32>
      %175 = vector.broadcast %1 : vector<1x128xf32> to vector<8x128xf32>
      %176 = arith.addf %174, %175 : vector<8x128xf32>
      %177 = arith.truncf %176 : vector<8x128xf32> to vector<8x128xbf16>
      %c0_71 = arith.constant 0 : index
      %c0_72 = arith.constant 0 : index
      %178 = vector.load %arg6[%c0_71, %c0_72] : memref<128x128xbf16, #tpu.memory_space<vmem>>, vector<128x128xbf16>
      %cst_73 = arith.constant dense<0.000000e+00> : vector<8x128xf32>
      %179 = tpu.matmul %147, %178, %cst_73 {dimension_numbers = #tpu.dot_dimension_numbers<[1], [0], [0], [1], [0, 0, 1, 1], [], []>} : vector<8x128xbf16>, vector<128x128xbf16>, vector<8x128xf32> -> vector<8x128xf32>
      %180 = arith.truncf %179 : vector<8x128xf32> to vector<8x128xbf16>
      %c0_74 = arith.constant 0 : index
      %c0_75 = arith.constant 0 : index
      %181 = vector.load %arg12[%c0_74, %c0_75] : memref<8x128xbf16, #tpu.memory_space<vmem>>, vector<8x128xbf16>
      tpu.vector_store %arg12[%c0_74, %c0_75], %180 {strides = array<i32>} : memref<8x128xbf16, #tpu.memory_space<vmem>>, vector<8x128xbf16>,
      %c0_76 = arith.constant 0 : index
      %c0_77 = arith.constant 0 : index
      %182 = vector.load %arg7[%c0_76, %c0_77] : memref<128x128xbf16, #tpu.memory_space<vmem>>, vector<128x128xbf16>
      %cst_78 = arith.constant dense<0.000000e+00> : vector<8x128xf32>
      %183 = tpu.matmul %177, %182, %cst_78 {dimension_numbers = #tpu.dot_dimension_numbers<[1], [0], [0], [1], [0, 0, 1, 1], [], []>} : vector<8x128xbf16>, vector<128x128xbf16>, vector<8x128xf32> -> vector<8x128xf32>
      %184 = arith.truncf %183 : vector<8x128xf32> to vector<8x128xbf16>
      %c0_79 = arith.constant 0 : index
      %c0_80 = arith.constant 0 : index
      %185 = vector.load %arg13[%c0_79, %c0_80] : memref<8x128xbf16, #tpu.memory_space<vmem>>, vector<8x128xbf16>
      tpu.vector_store %arg13[%c0_79, %c0_80], %184 {strides = array<i32>} : memref<8x128xbf16, #tpu.memory_space<vmem>>, vector<8x128xbf16>,
    } else {
    }
    %c0_4 = arith.constant 0 : index
    %c0_5 = arith.constant 0 : index
    %c0_6 = arith.constant 0 : index
    %5 = vector.load %arg2[%c0_4, %c0_5, %c0_6] : memref<1x8x128xf32, #tpu.memory_space<vmem>>, vector<1x8x128xf32>
    %6 = vector.shape_cast %5 : vector<1x8x128xf32> to vector<8x128xf32>
    %cst = arith.constant dense<0.000000e+00> : vector<8xf32>
    %7 = vector.multi_reduction <add>, %6, %cst [1] : vector<8x128xf32> to vector<8xf32>
    %8 = vector.shape_cast %7 : vector<8xf32> to vector<8x1xf32>
    %cst_7 = arith.constant 3.125000e-02 : f32
    %9 = vector.broadcast %cst_7 : f32 to vector<8x1xf32>
    %10 = arith.mulf %8, %9 : vector<8x1xf32>
    %11 = vector.broadcast %10 : vector<8x1xf32> to vector<8x128xf32>
    %12 = arith.subf %6, %11 : vector<8x128xf32>
    %13 = tpu.iota {dimensions = array<i32: 1>} : vector<1x128xi32>
    %c32_i32 = arith.constant 32 : i32
    %14 = vector.broadcast %c32_i32 : i32 to vector<1x128xi32>
    %15 = arith.cmpi slt, %13, %14 : vector<1x128xi32>
    %cst_8 = arith.constant 0.000000e+00 : f32
    %16 = vector.shape_cast %15 : vector<1x128xi1> to vector<1x128xi1>
    %17 = vector.broadcast %16 : vector<1x128xi1> to vector<8x128xi1>
    %18 = vector.broadcast %cst_8 : f32 to vector<8x128xf32>
    %19 = arith.select %17, %12, %18 : vector<8x128xi1>, vector<8x128xf32>
    %20 = arith.mulf %19, %19 : vector<8x128xf32>
    %cst_9 = arith.constant dense<0.000000e+00> : vector<8xf32>
    %21 = vector.multi_reduction <add>, %20, %cst_9 [1] : vector<8x128xf32> to vector<8xf32>
    %22 = vector.shape_cast %21 : vector<8xf32> to vector<8x1xf32>
    %cst_10 = arith.constant 3.125000e-02 : f32
    %23 = vector.broadcast %cst_10 : f32 to vector<8x1xf32>
    %24 = arith.mulf %22, %23 : vector<8x1xf32>
    %cst_11 = arith.constant 9.99999997E-7 : f32
    %25 = vector.broadcast %cst_11 : f32 to vector<8x1xf32>
    %26 = arith.addf %24, %25 : vector<8x1xf32>
    %27 = math.rsqrt %26 : vector<8x1xf32>
    %28 = vector.broadcast %27 : vector<8x1xf32> to vector<8x128xf32>
    %29 = arith.mulf %19, %28 : vector<8x128xf32>
    %30 = vector.broadcast %0 : vector<1x128xf32> to vector<8x128xf32>
    %31 = arith.mulf %29, %30 : vector<8x128xf32>
    %32 = vector.broadcast %1 : vector<1x128xf32> to vector<8x128xf32>
    %33 = arith.addf %31, %32 : vector<8x128xf32>
    %34 = arith.truncf %33 : vector<8x128xf32> to vector<8x128xbf16>
    %c0_12 = arith.constant 0 : index
    %c0_13 = arith.constant 0 : index
    %35 = vector.load %arg5[%c0_12, %c0_13] : memref<128x128xbf16, #tpu.memory_space<vmem>>, vector<128x128xbf16>
    %cst_14 = arith.constant dense<0.000000e+00> : vector<8x128xf32>
    %36 = tpu.matmul %34, %35, %cst_14 {dimension_numbers = #tpu.dot_dimension_numbers<[1], [0], [0], [1], [0, 0, 1, 1], [], []>} : vector<8x128xbf16>, vector<128x128xbf16>, vector<8x128xf32> -> vector<8x128xf32>
    %37 = arith.truncf %36 : vector<8x128xf32> to vector<8x128xbf16>
    %c0_15 = arith.constant 0 : index
    %c0_16 = arith.constant 0 : index
    %38 = vector.load %arg12[%c0_15, %c0_16] : memref<8x128xbf16, #tpu.memory_space<vmem>>, vector<8x128xbf16>
    %c0_17 = arith.constant 0 : index
    %c0_18 = arith.constant 0 : index
    %39 = vector.load %arg13[%c0_17, %c0_18] : memref<8x128xbf16, #tpu.memory_space<vmem>>, vector<8x128xbf16>
    %cst_19 = arith.constant 0.000000e+00 : f32
    %40 = vector.broadcast %cst_19 : f32 to vector<8x128xf32>
    %c0_20 = arith.constant 0 : index
    %c0_21 = arith.constant 0 : index
    %41 = vector.load %arg14[%c0_20, %c0_21] : memref<8x128xf32, #tpu.memory_space<vmem>>, vector<8x128xf32>
    tpu.vector_store %arg14[%c0_20, %c0_21], %40 {strides = array<i32>} : memref<8x128xf32, #tpu.memory_space<vmem>>, vector<8x128xf32>,
    %42 = vector.extract_strided_slice %37 {offsets = [0, 0], sizes = [8, 8], strides = [1, 1]} : vector<8x128xbf16> to vector<8x8xbf16>
    %43 = vector.extract_strided_slice %38 {offsets = [0, 0], sizes = [8, 8], strides = [1, 1]} : vector<8x128xbf16> to vector<8x8xbf16>
    %44 = vector.extract_strided_slice %39 {offsets = [0, 0], sizes = [8, 8], strides = [1, 1]} : vector<8x128xbf16> to vector<8x8xbf16>
    %cst_22 = arith.constant dense<0.000000e+00> : vector<8x8xf32>
    %45 = tpu.matmul %42, %43, %cst_22 {dimension_numbers = #tpu.dot_dimension_numbers<[1], [1], [0], [0], [0, 0, 1, 0], [], []>} : vector<8x8xbf16>, vector<8x8xbf16>, vector<8x8xf32> -> vector<8x8xf32>
    %cst_23 = arith.constant dense<0xFF800000> : vector<8xf32>
    %46 = vector.multi_reduction <maximumf>, %45, %cst_23 [1] : vector<8x8xf32> to vector<8xf32>
    %47 = vector.shape_cast %46 : vector<8xf32> to vector<8x1xf32>
    %48 = vector.broadcast %47 : vector<8x1xf32> to vector<8x8xf32>
    %49 = arith.subf %45, %48 : vector<8x8xf32>
    %50 = math.exp %49 : vector<8x8xf32>
    %cst_24 = arith.constant dense<0.000000e+00> : vector<8xf32>
    %51 = vector.multi_reduction <add>, %50, %cst_24 [1] : vector<8x8xf32> to vector<8xf32>
    %52 = vector.shape_cast %51 : vector<8xf32> to vector<8x1xf32>
    %53 = tpu.reciprocal %52 {approx = true} : vector<8x1xf32> -> vector<8x1xf32>
    %54 = vector.broadcast %53 : vector<8x1xf32> to vector<8x8xf32>
    %55 = arith.mulf %50, %54 : vector<8x8xf32>
    %56 = arith.truncf %55 : vector<8x8xf32> to vector<8x8xbf16>
    %cst_25 = arith.constant dense<0.000000e+00> : vector<8x8xf32>
    %57 = tpu.matmul %56, %44, %cst_25 {dimension_numbers = #tpu.dot_dimension_numbers<[1], [0], [0], [1], [0, 0, 1, 1], [], []>} : vector<8x8xbf16>, vector<8x8xbf16>, vector<8x8xf32> -> vector<8x8xf32>
    %c0_26 = arith.constant 0 : index
    %c0_27 = arith.constant 0 : index
    %58 = vector.load %arg14[%c0_26, %c0_27] : memref<8x128xf32, #tpu.memory_space<vmem>>, vector<8x8xf32>
    tpu.vector_store %arg14[%c0_26, %c0_27], %57 {strides = array<i32>} : memref<8x128xf32, #tpu.memory_space<vmem>>, vector<8x8xf32>,
    %59 = vector.extract_strided_slice %37 {offsets = [0, 8], sizes = [8, 8], strides = [1, 1]} : vector<8x128xbf16> to vector<8x8xbf16>
    %60 = vector.extract_strided_slice %38 {offsets = [0, 8], sizes = [8, 8], strides = [1, 1]} : vector<8x128xbf16> to vector<8x8xbf16>
    %61 = vector.extract_strided_slice %39 {offsets = [0, 8], sizes = [8, 8], strides = [1, 1]} : vector<8x128xbf16> to vector<8x8xbf16>
    %cst_28 = arith.constant dense<0.000000e+00> : vector<8x8xf32>
    %62 = tpu.matmul %59, %60, %cst_28 {dimension_numbers = #tpu.dot_dimension_numbers<[1], [1], [0], [0], [0, 0, 1, 0], [], []>} : vector<8x8xbf16>, vector<8x8xbf16>, vector<8x8xf32> -> vector<8x8xf32>
    %cst_29 = arith.constant dense<0xFF800000> : vector<8xf32>
    %63 = vector.multi_reduction <maximumf>, %62, %cst_29 [1] : vector<8x8xf32> to vector<8xf32>
    %64 = vector.shape_cast %63 : vector<8xf32> to vector<8x1xf32>
    %65 = vector.broadcast %64 : vector<8x1xf32> to vector<8x8xf32>
    %66 = arith.subf %62, %65 : vector<8x8xf32>
    %67 = math.exp %66 : vector<8x8xf32>
    %cst_30 = arith.constant dense<0.000000e+00> : vector<8xf32>
    %68 = vector.multi_reduction <add>, %67, %cst_30 [1] : vector<8x8xf32> to vector<8xf32>
    %69 = vector.shape_cast %68 : vector<8xf32> to vector<8x1xf32>
    %70 = tpu.reciprocal %69 {approx = true} : vector<8x1xf32> -> vector<8x1xf32>
    %71 = vector.broadcast %70 : vector<8x1xf32> to vector<8x8xf32>
    %72 = arith.mulf %67, %71 : vector<8x8xf32>
    %73 = arith.truncf %72 : vector<8x8xf32> to vector<8x8xbf16>
    %cst_31 = arith.constant dense<0.000000e+00> : vector<8x8xf32>
    %74 = tpu.matmul %73, %61, %cst_31 {dimension_numbers = #tpu.dot_dimension_numbers<[1], [0], [0], [1], [0, 0, 1, 1], [], []>} : vector<8x8xbf16>, vector<8x8xbf16>, vector<8x8xf32> -> vector<8x8xf32>
    %c0_32 = arith.constant 0 : index
    %c8 = arith.constant 8 : index
    %75 = vector.load %arg14[%c0_32, %c8] : memref<8x128xf32, #tpu.memory_space<vmem>>, vector<8x8xf32>
    tpu.vector_store %arg14[%c0_32, %c8], %74 {strides = array<i32>} : memref<8x128xf32, #tpu.memory_space<vmem>>, vector<8x8xf32>,
    %76 = vector.extract_strided_slice %37 {offsets = [0, 16], sizes = [8, 8], strides = [1, 1]} : vector<8x128xbf16> to vector<8x8xbf16>
    %77 = vector.extract_strided_slice %38 {offsets = [0, 16], sizes = [8, 8], strides = [1, 1]} : vector<8x128xbf16> to vector<8x8xbf16>
    %78 = vector.extract_strided_slice %39 {offsets = [0, 16], sizes = [8, 8], strides = [1, 1]} : vector<8x128xbf16> to vector<8x8xbf16>
    %cst_33 = arith.constant dense<0.000000e+00> : vector<8x8xf32>
    %79 = tpu.matmul %76, %77, %cst_33 {dimension_numbers = #tpu.dot_dimension_numbers<[1], [1], [0], [0], [0, 0, 1, 0], [], []>} : vector<8x8xbf16>, vector<8x8xbf16>, vector<8x8xf32> -> vector<8x8xf32>
    %cst_34 = arith.constant dense<0xFF800000> : vector<8xf32>
    %80 = vector.multi_reduction <maximumf>, %79, %cst_34 [1] : vector<8x8xf32> to vector<8xf32>
    %81 = vector.shape_cast %80 : vector<8xf32> to vector<8x1xf32>
    %82 = vector.broadcast %81 : vector<8x1xf32> to vector<8x8xf32>
    %83 = arith.subf %79, %82 : vector<8x8xf32>
    %84 = math.exp %83 : vector<8x8xf32>
    %cst_35 = arith.constant dense<0.000000e+00> : vector<8xf32>
    %85 = vector.multi_reduction <add>, %84, %cst_35 [1] : vector<8x8xf32> to vector<8xf32>
    %86 = vector.shape_cast %85 : vector<8xf32> to vector<8x1xf32>
    %87 = tpu.reciprocal %86 {approx = true} : vector<8x1xf32> -> vector<8x1xf32>
    %88 = vector.broadcast %87 : vector<8x1xf32> to vector<8x8xf32>
    %89 = arith.mulf %84, %88 : vector<8x8xf32>
    %90 = arith.truncf %89 : vector<8x8xf32> to vector<8x8xbf16>
    %cst_36 = arith.constant dense<0.000000e+00> : vector<8x8xf32>
    %91 = tpu.matmul %90, %78, %cst_36 {dimension_numbers = #tpu.dot_dimension_numbers<[1], [0], [0], [1], [0, 0, 1, 1], [], []>} : vector<8x8xbf16>, vector<8x8xbf16>, vector<8x8xf32> -> vector<8x8xf32>
    %c0_37 = arith.constant 0 : index
    %c16 = arith.constant 16 : index
    %92 = vector.load %arg14[%c0_37, %c16] : memref<8x128xf32, #tpu.memory_space<vmem>>, vector<8x8xf32>
    tpu.vector_store %arg14[%c0_37, %c16], %91 {strides = array<i32>} : memref<8x128xf32, #tpu.memory_space<vmem>>, vector<8x8xf32>,
    %93 = vector.extract_strided_slice %37 {offsets = [0, 24], sizes = [8, 8], strides = [1, 1]} : vector<8x128xbf16> to vector<8x8xbf16>
    %94 = vector.extract_strided_slice %38 {offsets = [0, 24], sizes = [8, 8], strides = [1, 1]} : vector<8x128xbf16> to vector<8x8xbf16>
    %95 = vector.extract_strided_slice %39 {offsets = [0, 24], sizes = [8, 8], strides = [1, 1]} : vector<8x128xbf16> to vector<8x8xbf16>
    %cst_38 = arith.constant dense<0.000000e+00> : vector<8x8xf32>
    %96 = tpu.matmul %93, %94, %cst_38 {dimension_numbers = #tpu.dot_dimension_numbers<[1], [1], [0], [0], [0, 0, 1, 0], [], []>} : vector<8x8xbf16>, vector<8x8xbf16>, vector<8x8xf32> -> vector<8x8xf32>
    %cst_39 = arith.constant dense<0xFF800000> : vector<8xf32>
    %97 = vector.multi_reduction <maximumf>, %96, %cst_39 [1] : vector<8x8xf32> to vector<8xf32>
    %98 = vector.shape_cast %97 : vector<8xf32> to vector<8x1xf32>
    %99 = vector.broadcast %98 : vector<8x1xf32> to vector<8x8xf32>
    %100 = arith.subf %96, %99 : vector<8x8xf32>
    %101 = math.exp %100 : vector<8x8xf32>
    %cst_40 = arith.constant dense<0.000000e+00> : vector<8xf32>
    %102 = vector.multi_reduction <add>, %101, %cst_40 [1] : vector<8x8xf32> to vector<8xf32>
    %103 = vector.shape_cast %102 : vector<8xf32> to vector<8x1xf32>
    %104 = tpu.reciprocal %103 {approx = true} : vector<8x1xf32> -> vector<8x1xf32>
    %105 = vector.broadcast %104 : vector<8x1xf32> to vector<8x8xf32>
    %106 = arith.mulf %101, %105 : vector<8x8xf32>
    %107 = arith.truncf %106 : vector<8x8xf32> to vector<8x8xbf16>
    %cst_41 = arith.constant dense<0.000000e+00> : vector<8x8xf32>
    %108 = tpu.matmul %107, %95, %cst_41 {dimension_numbers = #tpu.dot_dimension_numbers<[1], [0], [0], [1], [0, 0, 1, 1], [], []>} : vector<8x8xbf16>, vector<8x8xbf16>, vector<8x8xf32> -> vector<8x8xf32>
    %c0_42 = arith.constant 0 : index
    %c24 = arith.constant 24 : index
    %109 = vector.load %arg14[%c0_42, %c24] : memref<8x128xf32, #tpu.memory_space<vmem>>, vector<8x8xf32>
    tpu.vector_store %arg14[%c0_42, %c24], %108 {strides = array<i32>} : memref<8x128xf32, #tpu.memory_space<vmem>>, vector<8x8xf32>,
    %c0_43 = arith.constant 0 : index
    %c0_44 = arith.constant 0 : index
    %110 = vector.load %arg14[%c0_43, %c0_44] : memref<8x128xf32, #tpu.memory_space<vmem>>, vector<8x128xf32>
    %111 = arith.truncf %110 : vector<8x128xf32> to vector<8x128xbf16>
    %c0_45 = arith.constant 0 : index
    %c0_46 = arith.constant 0 : index
    %112 = vector.load %arg8[%c0_45, %c0_46] : memref<128x128xbf16, #tpu.memory_space<vmem>>, vector<128x128xbf16>
    %cst_47 = arith.constant dense<0.000000e+00> : vector<8x128xf32>
    %113 = tpu.matmul %111, %112, %cst_47 {dimension_numbers = #tpu.dot_dimension_numbers<[1], [0], [0], [1], [0, 0, 1, 1], [], []>} : vector<8x128xbf16>, vector<128x128xbf16>, vector<8x128xf32> -> vector<8x128xf32>
    %114 = arith.addf %113, %6 : vector<8x128xf32>
    %c0_48 = arith.constant 0 : index
    %c0_49 = arith.constant 0 : index
    %c0_50 = arith.constant 0 : index
    %115 = vector.load %arg11[%c0_48, %c0_49, %c0_50] : memref<1x8x128xf32, #tpu.memory_space<vmem>>, vector<1x8x128xf32>
    %116 = vector.shape_cast %115 : vector<1x8x128xf32> to vector<8x128xf32>
    %117 = vector.shape_cast %114 : vector<8x128xf32> to vector<1x8x128xf32>
    tpu.vector_store %arg11[%c0_48, %c0_49, %c0_50], %117 {strides = array<i32>} : memref<1x8x128xf32, #tpu.memory_space<vmem>>, vector<1x8x128xf32>,
    return
  }
  func.func @transform_0(%arg0: i32, %arg1: i32) -> (i32, i32, i32) {
    %c0_i32 = arith.constant 0 : i32
    %c0_i32_0 = arith.constant 0 : i32
    return %arg0, %arg1, %c0_i32 : i32, i32, i32
  }
  func.func @transform_1(%arg0: i32, %arg1: i32) -> (i32, i32, i32) {
    %c0_i32 = arith.constant 0 : i32
    %c0_i32_0 = arith.constant 0 : i32
    %c0_i32_1 = arith.constant 0 : i32
    return %arg0, %c0_i32, %c0_i32_0 : i32, i32, i32
  }
  func.func @transform_2(%arg0: i32, %arg1: i32) -> (i32, i32, i32) {
    %c0_i32 = arith.constant 0 : i32
    %c0_i32_0 = arith.constant 0 : i32
    %c0_i32_1 = arith.constant 0 : i32
    return %arg0, %c0_i32, %c0_i32_0 : i32, i32, i32
  }
  func.func @transform_3(%arg0: i32, %arg1: i32) -> (i32, i32) {
    %c0_i32 = arith.constant 0 : i32
    %c0_i32_0 = arith.constant 0 : i32
    %c0_i32_1 = arith.constant 0 : i32
    return %c0_i32, %c0_i32_0 : i32, i32
  }
  func.func @transform_4(%arg0: i32, %arg1: i32) -> (i32, i32) {
    %c0_i32 = arith.constant 0 : i32
    %c0_i32_0 = arith.constant 0 : i32
    %c0_i32_1 = arith.constant 0 : i32
    return %c0_i32, %c0_i32_0 : i32, i32
  }
  func.func @transform_5(%arg0: i32, %arg1: i32) -> (i32, i32) {
    %c0_i32 = arith.constant 0 : i32
    %c0_i32_0 = arith.constant 0 : i32
    %c0_i32_1 = arith.constant 0 : i32
    return %c0_i32, %c0_i32_0 : i32, i32
  }
  func.func @transform_6(%arg0: i32, %arg1: i32) -> (i32, i32) {
    %c0_i32 = arith.constant 0 : i32
    %c0_i32_0 = arith.constant 0 : i32
    %c0_i32_1 = arith.constant 0 : i32
    return %c0_i32, %c0_i32_0 : i32, i32
  }
  func.func @transform_7(%arg0: i32, %arg1: i32) -> (i32, i32) {
    %c0_i32 = arith.constant 0 : i32
    %c0_i32_0 = arith.constant 0 : i32
    %c0_i32_1 = arith.constant 0 : i32
    return %c0_i32, %c0_i32_0 : i32, i32
  }
  func.func @transform_8(%arg0: i32, %arg1: i32) -> (i32, i32) {
    %c0_i32 = arith.constant 0 : i32
    %c0_i32_0 = arith.constant 0 : i32
    %c0_i32_1 = arith.constant 0 : i32
    return %c0_i32, %c0_i32_0 : i32, i32
  }
  func.func @transform_9(%arg0: i32, %arg1: i32) -> (i32, i32, i32) {
    %c0_i32 = arith.constant 0 : i32
    %c0_i32_0 = arith.constant 0 : i32
    return %arg0, %arg1, %c0_i32 : i32, i32, i32
  }
}

</mosaic_0001>

<bundles_post_ra>
// kernel: multi_head_attention4.1
= control target key start
LH: loop header
LB: loop body
LE: loop exit
PB: predicated region body
PF: predicated region fallthrough
CT: control target
= control target key end

     0   :  { %14 = vsyncpa [#allocation6], 0  ;;  %s2335_s0 = inlined_call_operand.vmem [shape: f32[2,8,128], index: 0, kind: input, shape index: {}]   ;;  %s2336_s1 = inlined_call_operand.vmem [shape: f32[2,8,128], index: 1, kind: input, shape index: {}]   ;;  %s2337_s2 = inlined_call_operand.vmem [shape: f32[2,8,128], index: 2, kind: input, shape index: {}]   ;;  %s2338_s3 = inlined_call_operand.vmem [shape: bf16[128,128], index: 3, kind: input, shape index: {}]   ;;  %s2339_s4 = inlined_call_operand.vmem [shape: bf16[128,128], index: 4, kind: input, shape index: {}]   ;;  %s2340_s5 = inlined_call_operand.vmem [shape: bf16[128,128], index: 5, kind: input, shape index: {}]   ;;  %s2341_s6 = inlined_call_operand.vmem [shape: bf16[128,128], index: 6, kind: input, shape index: {}]   ;;  %s2342_s7 = inlined_call_operand.vmem [shape: f32[1,128], index: 7, kind: input, shape index: {}]   ;;  %s2343_s8 = inlined_call_operand.vmem [shape: f32[1,128], index: 8, kind: input, shape index: {}]   ;;  %s2344_s9 = inlined_call_operand.hbm [shape: f32[2,8,128], index: 9, kind: output, shape index: {}]  }
   0x1   :  { %16 = vsyncpa [#allocation6 + $0x1], 0  ;;  %s1975_s30 = smov 0   ;;  %s1977_s10 = smov 0  }
   0x2   :  { %s1979_s11 = smov 0   ;;  %s1981_s12 = smov 0  }
   0x3   :  { %s1983_s13 = smov 0   ;;  %s1985_s14 = smov 0  }
   0x4 LB: > { %s1481_s15 = sadd.s32 4294967295, %s1914_s14   ;;  %s1482_s16 = sadd.s32 4294967294, %s1914_s14   ;;  %s1914_s14 = sphi %s1985_s14, %s22_s14   ;;  %s1910_s13 = sphi %s1983_s13, %s2354_s13   ;;  %s1906_s12 = sphi %s1981_s12, %s2353_s12   ;;  %s1902_s11 = sphi %s1979_s11, %s2352_s11   ;;  %s1898_s10 = sphi %s1977_s10, %s2351_s10   ;;  %s1894_s30 = sphi %s1975_s30, %s2350_s30  }
   0x5   : > { %s34_s17 = sadd.s32 1, %s1910_s13  ;;  %s249_s18 = sadd.s32 1, %s1902_s11 }
   0x6   : > { %p36_p0 = scmp.ge.s32.totalorder %s34_s17, 2  ;;  %p259_p1 = scmp.ne.s32.totalorder %s1902_s11, %s1898_s10 }
   0x7   : > { %p260_p2 = scmp.eq.s32.totalorder %s1481_s15, 1  ;;  %p265_p3 = scmp.ne.s32.totalorder %s1898_s10, %s1894_s30 }
   0x8   : > { %s2356_s17 = smov (%p36_p0, %s34_s17), 0  ;;  %p266_p5 = scmp.eq.s32.totalorder %s1482_s16, 1 }
   0x9   : > { %2346 = sst [smem:[#allocation8_spill]] %s2356_s17  ;;  %p2015_p4 = por %p260_p2, %p259_p1 }
   0xa   : > { %s244_s20 = ssub.s32 %s1910_s13, %s2356_s17  ;;  %p1485_p6 = scmp.ge.s32.totalorder %s1914_s14, 1 }
   0xb   : > { %p247_p7 = scmp.eq.s32.totalorder %s244_s20, 0  ;;  %p2022_p8 = por %p266_p5, %p265_p3 }
   0xc   : > { %p326_p9 = scmp.lt.s32.totalorder %s1914_s14, 3 }
   0xd   : > { %s2028_s22 = scalar_select %p247_p7, %s1902_s11, %s249_s18  }
   0xe   : > { %p327_p10 = pnand %p1485_p6, %p326_p9 }
   0xf   : > { %p372_p11 = scmp.lt.s32.totalorder (!%p327_p10), %s1906_s12, 1  ;;  %v1781_v3 = vld [vmem:[%s2339_s4] sm:$0xff] (!%p327_p10)   ;;  %v1916_v4 = vmov (!%p327_p10), 0.0   ;;  %v1782_v5 = vld [vmem:[%s2339_s4 + $0x8] sm:$0xff] (!%p327_p10)   ;;  %v1783_v6 = vld [vmem:[%s2339_s4 + $0x10] sm:$0xff] (!%p327_p10)   ;;  %v399_v7 = vlaneseq (!%p327_p10)  ;;  %vm1917_vm1 = vmmov (!%p327_p10), 0  }
  0x10   : > { %330 = sbr.rel (%p327_p10) target bundleno = 3289 (0xcd9), region = 56  ;;  %1590 = vmatprep.subr.bf16.mxu0 (!%p327_p10), %v1916_v4  ;;  %795 = vst [vmem:[#allocation4] sm:$0xff] (!%p327_p10), %v1916_v4  ;;  %1610 = vmatprep.subr.bf16.mxu1 (!%p327_p10), %v1916_v4  ;;  %v1784_v24 = vld [vmem:[%s2339_s4 + $0x18] sm:$0xff] (!%p327_p10)   ;;  %v1785_v25 = vld [vmem:[%s2339_s4 + $0x20] sm:$0xff] (!%p327_p10)   ;;  %v1786_v26 = vld [vmem:[%s2339_s4 + $0x28] sm:$0xff] (!%p327_p10)   ;;  %vm796_vm2 = vcmask (!%p327_p10), 64512  }
  0x11   : > { %1591 = vmatpush3.bf16.msra.mxu0 (!%p327_p10), %v1781_v3  ;;  %v400_v8 = vand.u32 (!%p327_p10), 127, %v399_v7  ;;  %1606 = vmatprep.mubr.msk.bf16.mxu0 (!%p327_p10), %vm1917_vm1, %v1916_v4  ;;  %v1787_v27 = vld [vmem:[%s2339_s4 + $0x30] sm:$0xff] (!%p327_p10)   ;;  %v1788_v28 = vld [vmem:[%s2339_s4 + $0x38] sm:$0xff] (!%p327_p10)   ;;  %v1797_v29 = vld [vmem:[%s2340_s5] sm:$0xff] (!%p327_p10)   ;;  %vm858_vm3 = vcmask (!%p327_p10), 1043456   ;;  %s1920_s17 = smov (!%p327_p10), 104  }
  0x12   : > { %1592 = vmatprep.subr.bf16.mxu0 (!%p327_p10), %v1916_v4  ;;  %1626 = vmatprep.mubr.msk.bf16.mxu1 (!%p327_p10), %vm1917_vm1, %v1916_v4  ;;  %v1798_v30 = vld [vmem:[%s2340_s5 + $0x8] sm:$0xff] (!%p327_p10)   ;;  %v1799_v31 = vld [vmem:[%s2340_s5 + $0x10] sm:$0xff] (!%p327_p10)   ;;  %v1800_v32 = vld [vmem:[%s2340_s5 + $0x18] sm:$0xff] (!%p327_p10)   ;;  %s1921_s28 = smov (!%p327_p10), 16   ;;  %s1922_s29 = smov (!%p327_p10), 8   ;;  %vm1024_vm4 = vcmask (!%p327_p10), 130112  }
  0x13   : > { %vm401_vm0 = vcmp.lt.s32.totalorder (!%p327_p10), %v400_v8, 32  ;;  %1611 = vmatpush3.bf16.msra.mxu1 (!%p327_p10), %v1797_v29  ;;  %v1801_v33 = vld [vmem:[%s2340_s5 + $0x20] sm:$0xff] (!%p327_p10)   ;;  %v1802_v34 = vld [vmem:[%s2340_s5 + $0x28] sm:$0xff] (!%p327_p10)   ;;  %v1803_v35 = vld [vmem:[%s2340_s5 + $0x30] sm:$0xff] (!%p327_p10)   ;;  %vm1140_vm5 = vcmask (!%p327_p10), 195712   ;;  %vm1256_vm6 = vcmask (!%p327_p10), 261312  }
  0x14   : > { %1612 = vmatprep.subr.bf16.mxu1 (!%p327_p10), %v1916_v4  ;;  %v1804_v36 = vld [vmem:[%s2340_s5 + $0x38] sm:$0xff] (!%p327_p10)   ;;  %v1536_v45 = vld [vmem:[%s2342_s7] ss:$0 sm:$0xff] (!%p327_p10)  ;;  %v1790_v56 = vld [vmem:[%s2338_s3 + $0x8] sm:$0xff] (!%p327_p10)   ;;  %s369_s25 = sand.u32 (!%p327_p10), 1, %s1898_s10   ;;  %s1924_s18 = smov (!%p327_p10), [#allocation5]  }
  0x15   : > { %1593 = vmatpush3.bf16.msra.mxu0 (!%p327_p10), %v1782_v5  ;;  %v1537_v47 = vld [vmem:[%s2343_s8] ss:$0 sm:$0xff] (!%p327_p10)  ;;  %v1791_v59 = vld [vmem:[%s2338_s3 + $0x10] sm:$0xff] (!%p327_p10)   ;;  %v1792_v61 = vld [vmem:[%s2338_s3 + $0x18] sm:$0xff] (!%p327_p10)   ;;  %s1486_s26 = sshll.u32 (!%p327_p10), %s369_s25, 3 }
  0x16   : > { %1594 = vmatprep.subr.bf16.mxu0 (!%p327_p10), %v1916_v4  ;;  %v1789_v51 = vld [vmem:[%s2338_s3] sm:$0xff] (!%p327_p10)   ;;  %v1795_v3 = vld [vmem:[%s2338_s3 + $0x30] sm:$0xff] (!%p327_p10)  }
  0x17   : > { %s373_s23 = scalar_select %p372_p11, %s1906_s12, 1  ;;  %1613 = vmatpush3.bf16.msra.mxu1 %v1798_v30  ;;  %v1793_v62 = vld [vmem:[%s2338_s3 + $0x20] sm:$0xff]  }
  0x18   : > { %1614 = vmatprep.subr.bf16.mxu1 %v1916_v4 }
  0x19   : > { %s1487_s24 = sshll.u32 %s373_s23, 3  ;;  %1595 = vmatpush3.bf16.msra.mxu0 %v1783_v6  ;;  %v1796_v6 = vld [vmem:[%s2338_s3 + $0x38] sm:$0xff]   ;;  %s1923_s23 = smov 24  }
  0x1a   : > { %s382_s27 = scalar_lea.vmem %s2336_s1, %s1487_s24  ;;  %s378_s15 = scalar_lea.vmem %s2335_s0, %s1487_s24  ;;  %1596 = vmatprep.subr.bf16.mxu0 %v1916_v4 }
  0x1b   : > { %v394_v0 = vld [vmem:[%s382_s27] sm:$0xff]  ;;  %s386_s20 = scalar_lea.vmem %s2337_s2, %s1487_s24  ;;  %1615 = vmatpush3.bf16.msra.mxu1 %v1799_v31  ;;  %s1918_s24 = smov 120  }
  0x1c   : > { %395 = vadd.xlane.f32.xlu0 %v394_v0  ;;  %v2038_v1 = vld [vmem:[%s378_s15] sm:$0xff]  ;;  %1616 = vmatprep.subr.bf16.mxu1 %v1916_v4  ;;  %s1919_s27 = smov 112  }
  0x1d   : > { %v427_v2 = vld [vmem:[%s386_s20] sm:$0xff]  ;;  %1597 = vmatpush3.bf16.msra.mxu0 %v1784_v24  ;;  %s1840_s20 = sshll.u32 %s1924_s18, 4  ;;  %s1841_s20 = int_to_ptr.vmem [resolvable:$false] %s1840_s20 }
  0x1e   : > { %1598 = vmatprep.subr.bf16.mxu0 %v1916_v4 }
  0x1f   : > { %1617 = vmatpush3.bf16.msra.mxu1 %v1800_v32 }
  0x20   : > { %656 = vadd.xlane.f32.xlu0 %v2038_v1  ;;  %1618 = vmatprep.subr.bf16.mxu1 %v1916_v4 }
  0x21   : > { %1599 = vmatpush3.bf16.msra.mxu0 %v1785_v25 }
  0x22   : > { %1600 = vmatprep.subr.bf16.mxu0 %v1916_v4 }
  0x23   : > { %1619 = vmatpush3.bf16.msra.mxu1 %v1801_v33 }
  0x24   : > { %428 = vadd.xlane.f32.xlu0 %v427_v2  ;;  %1620 = vmatprep.subr.bf16.mxu1 %v1916_v4 }
  0x25   : > { %1601 = vmatpush3.bf16.msra.mxu0 %v1786_v26 }
  0x26   : > { %1602 = vmatprep.subr.bf16.mxu0 %v1916_v4 }
  0x27   : > { %1621 = vmatpush3.bf16.msra.mxu1 %v1802_v34 }
  0x28   : > { %1622 = vmatprep.subr.bf16.mxu1 %v1916_v4 }
  0x29   : > { %1603 = vmatpush3.bf16.msra.mxu0 %v1787_v27 }
  0x2a   : > { %1604 = vmatprep.subr.bf16.mxu0 %v1916_v4 }
  0x2b   : > { %1623 = vmatpush3.bf16.msra.mxu1 %v1803_v35 }
  0x2c   : > { %1624 = vmatprep.subr.bf16.mxu1 %v1916_v4 }
  0x2d   : > { %1605 = vmatpush3.bf16.msra.mxu0 %v1788_v28 }
  0x2e   : > { %1630 = vmatprep.subr.bf16.mxu0 %v1916_v4 }
  0x2f   : > { %1625 = vmatpush3.bf16.msra.mxu1 %v1804_v36 }
  0x30   : > { %1650 = vmatprep.subr.bf16.mxu1 %v1916_v4 }
  0xa9   : > { %v396_v9 = vpop.xlane.xlu0 %395 }
  0xaa   : > { %v397_v10 = vmul.f32 0.03125, %v396_v9 }
  0xac   : > { %v398_v11 = vsub.f32 %v394_v0, %v397_v10  ;;  %v1794_v0 = vld [vmem:[%s2338_s3 + $0x28] sm:$0xff]  }
  0xad   : > { %v657_v12 = vpop.xlane.xlu0 %656 }
  0xae   : > { %v658_v13 = vmul.f32 0.03125, %v657_v12  ;;  %v2059_v14 = vsel %vm401_vm0, %v398_v11, 0.0 }
  0xaf   : > { %v405_v15 = vmul.f32 %v2059_v14, %v2059_v14 }
  0xb0   : > { %v659_v16 = vsub.f32 %v2038_v1, %v658_v13 }
  0xb1   : > { %406 = vadd.xlane.f32.xlu1 %v405_v15  ;;  %v429_v17 = vpop.xlane.xlu0 %428 }
  0xb2   : > { %v2064_v18 = vsel %vm401_vm0, %v659_v16, 0.0  ;;  %v430_v19 = vmul.f32 0.03125, %v429_v17 }
  0xb3   : > { %v666_v20 = vmul.f32 %v2064_v18, %v2064_v18 }
  0xb4   : > { %v431_v21 = vsub.f32 %v427_v2, %v430_v19 }
  0xb5   : > { %667 = vadd.xlane.f32.xlu1 %v666_v20 }
  0xb6   : > { %v2068_v22 = vsel %vm401_vm0, %v431_v21, 0.0 }
  0xb7   : > { %v433_v23 = vmul.f32 %v2068_v22, %v2068_v22 }
  0xb9   : > { %434 = vadd.xlane.f32.xlu1 %v433_v23 }
 0x13e   : > { %v407_v37 = vpop.xlane.xlu1 %406 }
 0x13f   : > { %v408_v38 = vmul.f32 0.03125, %v407_v37 }
 0x141   : > { %v409_v39 = vadd.f32 1e-06, %v408_v38 }
 0x142   : > { %v668_v40 = vpop.xlane.xlu1 %667 }
 0x143   : > { %1814 = vrsqrt.f32 %v409_v39  ;;  %v669_v50 = vmul.f32 0.03125, %v668_v40 }
 0x145   : > { %v670_v55 = vadd.f32 1e-06, %v669_v50 }
 0x146   : > { %v435_v41 = vpop.xlane.xlu1 %434 }
 0x147   : > { %v436_v42 = vmul.f32 0.03125, %v435_v41 }
 0x149   : > { %v437_v43 = vadd.f32 1e-06, %v436_v42 }
 0x14b   : > { %1816 = vrsqrt.f32 %v437_v43 }
 0x14c   : > { %1818 = vrsqrt.f32 %v670_v55 }
 0x14d   : > { %v1815_v44 = vpop.eup %1814 }
 0x14e   : > { %v411_v46 = vmul.f32 %v1815_v44, %v2059_v14 }
 0x150   : > { %v418_v48 = vmul.f32 %v1536_v45, %v411_v46 }
 0x152   : > { %v425_v49 = vadd.f32 %v1537_v47, %v418_v48 }
 0x154   : > { %v426_v52 = vpack.c.bf16 %v425_v49, %v425_v49 }
 0x155   : > { %v1817_v53 = vpop.eup %1816 }
 0x156   : > { %1607 = vmatmul.mubr.bf16.vlgmr.msra.gmra.mrb[0].mxu0 %v426_v52  ;;  %v439_v54 = vmul.f32 %v1817_v53, %v2068_v22  ;;  %v1819_v63 = vpop.eup %1818 }
 0x157   : > { %1631 = vmatpush3.bf16.msra.mxu0 %v1789_v51  ;;  %1646 = vmatprep.mubr.msk.bf16.mxu0 %vm1917_vm1, %v1916_v4  ;;  %v672_v2 = vmul.f32 %v1819_v63, %v2064_v18 }
 0x158   : > { %1632 = vmatprep.subr.bf16.mxu0 %v1916_v4  ;;  %v440_v57 = vmul.f32 %v1536_v45, %v439_v54 }
 0x159   : > { %v679_v5 = vmul.f32 %v1536_v45, %v672_v2 }
 0x15a   : > { %v441_v58 = vadd.f32 %v1537_v47, %v440_v57 }
 0x15b   : > { %1633 = vmatpush3.bf16.msra.mxu0 %v1790_v56  ;;  %v686_v7 = vadd.f32 %v1537_v47, %v679_v5 }
 0x15c   : > { %1634 = vmatprep.subr.bf16.mxu0 %v1916_v4  ;;  %v442_v60 = vpack.c.bf16 %v441_v58, %v441_v58 }
 0x15d   : > { %v687_v8 = vpack.c.bf16 %v686_v7, %v686_v7 }
 0x15e   : > { %1627 = vmatmul.mubr.bf16.vlgmr.msra.gmra.mrb[0].mxu1 %v442_v60 }
 0x15f   : > { %1635 = vmatpush3.bf16.msra.mxu0 %v1791_v59  ;;  %1652 = vmatprep.mubr.msk.bf16.mxu1 %vm1917_vm1, %v1916_v4 }
 0x160   : > { %1636 = vmatprep.subr.bf16.mxu0 %v1916_v4 }
 0x163   : > { %1637 = vmatpush3.bf16.msra.mxu0 %v1792_v61 }
 0x164   : > { %1638 = vmatprep.subr.bf16.mxu0 %v1916_v4 }
 0x167   : > { %1639 = vmatpush3.bf16.msra.mxu0 %v1793_v62 }
 0x168   : > { %1640 = vmatprep.subr.bf16.mxu0 %v1916_v4 }
 0x16b   : > { %1641 = vmatpush3.bf16.msra.mxu0 %v1794_v0 }
 0x16c   : > { %1642 = vmatprep.subr.bf16.mxu0 %v1916_v4 }
 0x16f   : > { %1643 = vmatpush3.bf16.msra.mxu0 %v1795_v3 }
 0x170   : > { %1644 = vmatprep.subr.bf16.mxu0 %v1916_v4 }
 0x173   : > { %1645 = vmatpush3.bf16.msra.mxu0 %v1796_v6 }
 0x174   : > { %1698 = vmatprep.subr.bf16.mxu0 %v1916_v4 }
 0x176   : > { %1647 = vmatmul.mubr.bf16.vlgmr.msra.gmra.mrb[4].mxu0 %v687_v8 }
 0x177   : > { %1714 = vmatprep.mubr.msk.bf16.mxu0 %vm1917_vm1, %v1916_v4 }
 0x229   : > { %v541_v9 = vpop.f32.mrb[0].mxu0 }
 0x22a   : > { %v547_v10 = vpack.c.bf16 %v541_v9, %v541_v9  ;;  %v1608_v11 = vpop.f32.mrb[1].mxu0 }
 0x22b   : > { %v544_v12 = vpop.f32.mrb[2].mxu0 }
 0x22c   : > { %548 = vst [vmem:[#allocation2] sm:$0xf] %v547_v10  ;;  %v1609_v13 = vpop.f32.mrb[3].mxu0 }
 0x231   : > { %v647_v14 = vpop.f32.mrb[0].mxu1 }
 0x232   : > { %v653_v15 = vpack.c.bf16 %v647_v14, %v647_v14  ;;  %v1628_v16 = vpop.f32.mrb[1].mxu1 }
 0x233   : > { %v793_v17 = vld [vmem:[#allocation2] sm:$0xf]  ;;  %v650_v18 = vpop.f32.mrb[2].mxu1 }
 0x234   : > { %v801_v19 = vsel %vm796_vm2, %v793_v17, 0  ;;  %654 = vst [vmem:[#allocation3] sm:$0xf] %v653_v15  ;;  %v1629_v20 = vpop.f32.mrb[3].mxu1  ;;  %v2189_v33 = vcombine.low %v793_v17, %v793_v17 }
 0x235   : > { %1651 = vmatpush3.bf16.xpose.msra.mxu1 %v801_v19 }
 0x236   : > { %1656 = vmatprep.subr.bf16.mxu1 %v1916_v4 }
 0x23b   : > { %v2177_v21 = vld [vmem:[#allocation3] sm:$0xf] }
 0x23c   : > { %v860_v25 = vsel %vm858_vm3, %v2177_v21, 0  ;;  %v2213_v60 = vcombine.low %v2177_v21, %v2177_v21 }
 0x249   : > { %v786_v22 = vpop.f32.mrb[4].mxu0 }
 0x24a   : > { %v2179_v23 = vpack.c.bf16 %v786_v22, %v786_v22  ;;  %v1648_v24 = vpop.f32.mrb[5].mxu0 }
 0x24b   : > { %v789_v26 = vpop.f32.mrb[6].mxu0 }
 0x24c   : > { %v1649_v27 = vpop.f32.mrb[7].mxu0  ;;  %1653 = vmatmul.mubr.msk.bf16.vlgmr.msra.gmra.mrb[4].mxu1 %vm796_vm2, %v2179_v23 }
 0x24d   : > { %1657 = vmatpush3.bf16.msra.mxu1 %v860_v25  ;;  %1658 = vmatprep.mubr.msk.bf16.mxu1 %vm1917_vm1, %v1916_v4 }
 0x24e   : > { %1662 = vmatprep.subr.bf16.mxu1 %v1916_v4 }
 0x31f   : > { %v837_v28 = vpop.f32.mrb[4].mxu1 }
 0x320   : > { %v1654_v29 = vpop.f32.mrb[5].mxu1  ;;  %v843_v30 = vsel %vm796_vm2, %v837_v28, -inf }
 0x321   : > { %844 = vmax.xlane.f32.xlu0 %v843_v30  ;;  %v840_v31 = vpop.f32.mrb[6].mxu1 }
 0x322   : > { %v1655_v32 = vpop.f32.mrb[7].mxu1 }
 0x337   : > { %909 = vrot.lane.b32.xlu0 %v2189_v33, %s1918_s24 }
 0x3ae   : > { %v845_v34 = vpop.xlane.xlu0 %844 }
 0x3af   : > { %v846_v35 = vsub.f32 %v837_v28, %v845_v34 }
 0x3b1   : > { %v847_v36 = vmul.f32 1.442695, %v846_v35 }
 0x3b2   : > { %v910_v42 = vpop.permute.xlu0 %909 }
 0x3b3   : > { %1820 = vpow2.f32 %v847_v36  ;;  %v915_v44 = vsel %vm796_vm2, %v910_v42, 0 }
 0x3bd   : > { %v1821_v37 = vpop.eup %1820 }
 0x3be   : > { %v849_v38 = vsel %vm796_vm2, %v1821_v37, 0.0 }
 0x3bf   : > { %850 = vadd.xlane.f32.xlu1 %v849_v38 }
 0x3d0   : > { %904 = vrot.lane.b32.xlu1 %v2179_v23, %s1918_s24 }
 0x44c   : > { %v851_v39 = vpop.xlane.xlu1 %850 }
 0x44d   : > { %1822 = vrcp.f32 %v851_v39 }
 0x450   : > { %v905_v45 = vpop.permute.xlu1 %904 }
 0x457   : > { %v1823_v40 = vpop.eup %1822 }
 0x458   : > { %v853_v41 = vmul.f32 %v1823_v40, %v1821_v37 }
 0x45a   : > { %v854_v43 = vpack.c.bf16 %v853_v41, %v853_v41 }
 0x45c   : > { %1659 = vmatmul.mubr.msk.bf16.vlgmr.msra.gmra.mrb[8].mxu1 %vm796_vm2, %v854_v43 }
 0x45d   : > { %1663 = vmatpush3.bf16.xpose.msra.mxu1 %v915_v44  ;;  %1664 = vmatprep.mubr.msk.bf16.mxu1 %vm1917_vm1, %v1916_v4 }
 0x45e   : > { %1668 = vmatprep.subr.bf16.mxu1 %v1916_v4 }
 0x464   : > { %1665 = vmatmul.mubr.msk.bf16.vlgmr.msra.gmra.mrb[12].mxu1 %vm796_vm2, %v905_v45 }
 0x465   : > { %1670 = vmatprep.mubr.msk.bf16.mxu1 %vm1917_vm1, %v1916_v4 }
 0x52f   : > { %v896_v46 = vpop.f32.mrb[8].mxu1 }
 0x530   : > { %902 = vst.msk [vmem:[#allocation4] sm:$0xff] %vm796_vm2, %v896_v46  ;;  %v1660_v47 = vpop.f32.mrb[9].mxu1 }
 0x531   : > { %v899_v48 = vpop.f32.mrb[10].mxu1 }
 0x532   : > { %v1661_v49 = vpop.f32.mrb[11].mxu1 }
 0x537   : > { %v951_v50 = vpop.f32.mrb[12].mxu1 }
 0x538   : > { %v1666_v51 = vpop.f32.mrb[13].mxu1  ;;  %v957_v52 = vsel %vm796_vm2, %v951_v50, -inf }
 0x539   : > { %958 = vmax.xlane.f32.xlu1 %v957_v52  ;;  %v954_v53 = vpop.f32.mrb[14].mxu1 }
 0x53a   : > { %v1667_v54 = vpop.f32.mrb[15].mxu1  ;;  %v1806_v53 = vld [vmem:[%s2341_s6] sm:$0xff]  }
 0x53b   : > { %1699 = vmatpush3.bf16.msra.mxu0 %v1806_v53  ;;  %v1807_v54 = vld [vmem:[%s2341_s6 + $0x8] sm:$0xff]  }
 0x53c   : > { %1700 = vmatprep.subr.bf16.mxu0 %v1916_v4 }
 0x53f   : > { %1701 = vmatpush3.bf16.msra.mxu0 %v1807_v54 }
 0x540   : > { %1702 = vmatprep.subr.bf16.mxu0 %v1916_v4 }
 0x54a   : > { %1028 = vrot.lane.b32.xlu1 %v2189_v33, %s1919_s27 }
 0x54e   : > { %1026 = vrot.lane.b32.xlu1 %v2179_v23, %s1919_s27 }
 0x5c6   : > { %v959_v55 = vpop.xlane.xlu1 %958 }
 0x5c7   : > { %v960_v56 = vsub.f32 %v951_v50, %v959_v55  ;;  %v1808_v55 = vld [vmem:[%s2341_s6 + $0x10] sm:$0xff]  }
 0x5c8   : > { %1703 = vmatpush3.bf16.msra.mxu0 %v1808_v55 }
 0x5c9   : > { %v961_v57 = vmul.f32 1.442695, %v960_v56  ;;  %v1809_v56 = vld [vmem:[%s2341_s6 + $0x18] sm:$0xff]   ;;  %1704 = vmatprep.subr.bf16.mxu0 %v1916_v4 }
 0x5ca   : > { %v1029_v3 = vpop.permute.xlu1 %1028 }
 0x5cb   : > { %1824 = vpow2.f32 %v961_v57  ;;  %v1034_v6 = vsel %vm796_vm2, %v1029_v3, 0  ;;  %v1810_v57 = vld [vmem:[%s2341_s6 + $0x20] sm:$0xff]  }
 0x5cc   : > { %1705 = vmatpush3.bf16.msra.mxu0 %v1809_v56 }
 0x5cd   : > { %1706 = vmatprep.subr.bf16.mxu0 %v1916_v4 }
 0x5ce   : > { %v1027_v7 = vpop.permute.xlu1 %1026 }
 0x5d0   : > { %1707 = vmatpush3.bf16.msra.mxu0 %v1810_v57 }
 0x5d1   : > { %1708 = vmatprep.subr.bf16.mxu0 %v1916_v4 }
 0x5d5   : > { %v1825_v58 = vpop.eup %1824 }
 0x5d6   : > { %v963_v59 = vsel %vm796_vm2, %v1825_v58, 0.0 }
 0x5d7   : > { %964 = vadd.xlane.f32.xlu0 %v963_v59  ;;  %v1812_v59 = vld [vmem:[%s2341_s6 + $0x30] sm:$0xff]  }
 0x5ed   : > { %972 = vrot.lane.b32.xlu0 %v2213_v60, %s1918_s24  ;;  %s1533_s24 = sshll.u32 %s1906_s12, 7  ;;  %s1366_s12 = scalar_lea.sflag [#allocation6], %s369_s25 }
 0x5ee   : > { %s2288_s15 = scalar_lea.hbm %s2344_s9, %s1533_s24 }
 0x664   : > { %v965_v61 = vpop.xlane.xlu0 %964 }
 0x665   : > { %1826 = vrcp.f32 %v965_v61 }
 0x668   : > { %v973_v62 = vpop.permute.xlu0 %972 }
 0x669   : > { %v978_v63 = vsel %vm858_vm3, %v973_v62, 0 }
 0x66a   : > { %1669 = vmatpush3.bf16.msra.mxu1 %v978_v63 }
 0x66b   : > { %1674 = vmatprep.subr.bf16.mxu1 %v1916_v4 }
 0x66f   : > { %v1827_v0 = vpop.eup %1826 }
 0x670   : > { %v967_v2 = vmul.f32 %v1827_v0, %v1825_v58  ;;  %v1811_v58 = vld [vmem:[%s2341_s6 + $0x28] sm:$0xff]  }
 0x671   : > { %1709 = vmatpush3.bf16.msra.mxu0 %v1811_v58 }
 0x672   : > { %v968_v5 = vpack.c.bf16 %v967_v2, %v967_v2  ;;  %1710 = vmatprep.subr.bf16.mxu0 %v1916_v4 }
 0x674   : > { %1671 = vmatmul.mubr.msk.bf16.vlgmr.msra.gmra.mrb[16].mxu1 %vm796_vm2, %v968_v5 }
 0x675   : > { %1675 = vmatpush3.bf16.xpose.msra.mxu1 %v1034_v6  ;;  %1676 = vmatprep.mubr.msk.bf16.mxu1 %vm1917_vm1, %v1916_v4 }
 0x676   : > { %1680 = vmatprep.subr.bf16.mxu1 %v1916_v4  ;;  %1711 = vmatpush3.bf16.msra.mxu0 %v1812_v59 }
 0x677   : > { %1712 = vmatprep.subr.bf16.mxu0 %v1916_v4 }
 0x67c   : > { %1677 = vmatmul.mubr.msk.bf16.vlgmr.msra.gmra.mrb[20].mxu1 %vm796_vm2, %v1027_v7 }
 0x67d   : > { %1682 = vmatprep.mubr.msk.bf16.mxu1 %vm1917_vm1, %v1916_v4 }
 0x747   : > { %v1014_v8 = vpop.f32.mrb[16].mxu1 }
 0x748   : > { %v1672_v9 = vpop.f32.mrb[17].mxu1 }
 0x749   : > { %v1017_v10 = vpop.f32.mrb[18].mxu1 }
 0x74a   : > { %v1673_v11 = vpop.f32.mrb[19].mxu1 }
 0x74f   : > { %v1070_v12 = vpop.f32.mrb[20].mxu1 }
 0x750   : > { %v1678_v13 = vpop.f32.mrb[21].mxu1  ;;  %v1076_v14 = vsel %vm796_vm2, %v1070_v12, -inf }
 0x751   : > { %1077 = vmax.xlane.f32.xlu1 %v1076_v14  ;;  %v1073_v15 = vpop.f32.mrb[22].mxu1 }
 0x752   : > { %v1679_v16 = vpop.f32.mrb[23].mxu1 }
 0x762   : > { %1144 = vrot.lane.b32.xlu1 %v2189_v33, %s1920_s17 }
 0x766   : > { %1142 = vrot.lane.b32.xlu1 %v2179_v23, %s1920_s17 }
 0x7de   : > { %v1078_v17 = vpop.xlane.xlu1 %1077 }
 0x7df   : > { %v1079_v18 = vsub.f32 %v1070_v12, %v1078_v17 }
 0x7e1   : > { %v1080_v19 = vmul.f32 1.442695, %v1079_v18 }
 0x7e2   : > { %v1145_v27 = vpop.permute.xlu1 %1144 }
 0x7e3   : > { %1828 = vpow2.f32 %v1080_v19  ;;  %v1150_v29 = vsel %vm796_vm2, %v1145_v27, 0 }
 0x7e6   : > { %v1143_v30 = vpop.permute.xlu1 %1142 }
 0x7ed   : > { %v1829_v20 = vpop.eup %1828 }
 0x7ee   : > { %v1082_v21 = vsel %vm796_vm2, %v1829_v20, 0.0 }
 0x7ef   : > { %1083 = vadd.xlane.f32.xlu0 %v1082_v21 }
 0x805   : > { %1088 = vrot.lane.b32.xlu0 %v2213_v60, %s1919_s27  ;;  %s371_s27 = scalar_lea.vmem [#allocation5], %s1486_s26 }
 0x87c   : > { %v1084_v22 = vpop.xlane.xlu0 %1083 }
 0x87d   : > { %1830 = vrcp.f32 %v1084_v22 }
 0x880   : > { %v1089_v24 = vpop.permute.xlu0 %1088 }
 0x881   : > { %v1094_v25 = vsel %vm858_vm3, %v1089_v24, 0 }
 0x882   : > { %1681 = vmatpush3.bf16.msra.mxu1 %v1094_v25 }
 0x883   : > { %1686 = vmatprep.subr.bf16.mxu1 %v1916_v4 }
 0x887   : > { %v1831_v23 = vpop.eup %1830 }
 0x888   : > { %v1086_v26 = vmul.f32 %v1831_v23, %v1829_v20 }
 0x88a   : > { %v1087_v28 = vpack.c.bf16 %v1086_v26, %v1086_v26 }
 0x88c   : > { %1683 = vmatmul.mubr.msk.bf16.vlgmr.msra.gmra.mrb[24].mxu1 %vm796_vm2, %v1087_v28 }
 0x88d   : > { %1687 = vmatpush3.bf16.xpose.msra.mxu1 %v1150_v29  ;;  %1688 = vmatprep.mubr.msk.bf16.mxu1 %vm1917_vm1, %v1916_v4 }
 0x88e   : > { %1692 = vmatprep.subr.bf16.mxu1 %v1916_v4 }
 0x894   : > { %1689 = vmatmul.mubr.msk.bf16.vlgmr.msra.gmra.mrb[28].mxu1 %vm796_vm2, %v1143_v30 }
 0x895   : > { %1694 = vmatprep.mubr.msk.bf16.mxu1 %vm1917_vm1, %v1916_v4 }
 0x95f   : > { %v1130_v31 = vpop.f32.mrb[24].mxu1 }
 0x960   : > { %v1684_v32 = vpop.f32.mrb[25].mxu1 }
 0x961   : > { %v1133_v33 = vpop.f32.mrb[26].mxu1 }
 0x962   : > { %v1685_v34 = vpop.f32.mrb[27].mxu1 }
 0x967   : > { %v1186_v35 = vpop.f32.mrb[28].mxu1 }
 0x968   : > { %v1690_v36 = vpop.f32.mrb[29].mxu1  ;;  %v1192_v37 = vsel %vm796_vm2, %v1186_v35, -inf }
 0x969   : > { %1193 = vmax.xlane.f32.xlu0 %v1192_v37  ;;  %v1189_v38 = vpop.f32.mrb[30].mxu1 }
 0x96a   : > { %v1691_v39 = vpop.f32.mrb[31].mxu1 }
 0x97f   : > { %1204 = vrot.lane.b32.xlu0 %v2213_v60, %s1920_s17  ;;  %v1813_v60 = vld [vmem:[%s2341_s6 + $0x38] sm:$0xff]   ;;  %s1380_s17 = sshll.u32 %s371_s27, 4  ;;  %s2290_s17 = int_to_ptr.vmem [resolvable:$true] %s1380_s17 }
 0x980   : > { %1713 = vmatpush3.bf16.msra.mxu0 %v1813_v60  ;;  %s1836_s16 = scalar_lea.vmem %s2290_s17, 128  ;;  %p1843_p1 = scmp.lt.s32.totalorder %s2290_s17, %s1841_s20 }
 0x981   : > { %p1837_p12 = scmp.ne.s32.totalorder %s2290_s17, %s1836_s16 }
 0x983   : > { %1137 = vrot.lane.b32.xlu0 %v1130_v31, %s1921_s28  ;;  %p1838_p13 = pnand %p1837_p12, %p2015_p4 }
 0x985   : > { %p1839_p0 = pneg %p1838_p13 }
 0x9f6   : > { %v1194_v40 = vpop.xlane.xlu0 %1193 }
 0x9f7   : > { %v1195_v41 = vsub.f32 %v1186_v35, %v1194_v40 }
 0x9f9   : > { %v1196_v42 = vmul.f32 1.442695, %v1195_v41 }
 0x9fa   : > { %v1205_v43 = vpop.permute.xlu0 %1204 }
 0x9fb   : > { %1832 = vpow2.f32 %v1196_v42  ;;  %v1210_v44 = vsel %vm858_vm3, %v1205_v43, 0 }
 0x9fc   : > { %1693 = vmatpush3.bf16.msra.mxu1 %v1210_v44 }
 0x9fe   : > { %v1138_v49 = vpop.permute.xlu0 %1137 }
 0xa05   : > { %v1833_v45 = vpop.eup %1832 }
 0xa06   : > { %v1198_v46 = vsel %vm796_vm2, %v1833_v45, 0.0 }
 0xa07   : > { %1199 = vadd.xlane.f32.xlu1 %v1198_v46 }
 0xa18   : > { %1021 = vrot.lane.b32.xlu1 %v1014_v8, %s1922_s29 }
 0xa94   : > { %v1200_v47 = vpop.xlane.xlu1 %1199 }
 0xa95   : > { %1834 = vrcp.f32 %v1200_v47 }
 0xa98   : > { %v1022_v48 = vpop.permute.xlu1 %1021 }
 0xa99   : > { %1025 = vst.msk [vmem:[#allocation4] sm:$0xff] %vm1024_vm4, %v1022_v48 }
 0xa9a   : > { %1141 = vst.msk [vmem:[#allocation4] sm:$0xff] %vm1140_vm5, %v1138_v49 }
 0xa9f   : > { %v1835_v50 = vpop.eup %1834 }
 0xaa0   : > { %v1202_v51 = vmul.f32 %v1835_v50, %v1833_v45 }
 0xaa2   : > { %v1203_v52 = vpack.c.bf16 %v1202_v51, %v1202_v51 }
 0xaa4   : > { %1695 = vmatmul.mubr.msk.bf16.vlgmr.msra.gmra.mrb[32].mxu1 %vm796_vm2, %v1203_v52 }
 0xb77   : > { %v1246_v61 = vpop.f32.mrb[32].mxu1 }
 0xb78   : > { %1253 = vrot.lane.b32.xlu1 %v1246_v61, %s1923_s23  ;;  %v1696_v62 = vpop.f32.mrb[33].mxu1  ;;  %s1842_s23 = scalar_lea.vmem %s1841_s20, 256 }
 0xb79   : > { %v1249_v63 = vpop.f32.mrb[34].mxu1  ;;  %p1844_p2 = scmp.lt.s32.totalorder %s1842_s23, %s1836_s16 }
 0xb7a   : > { %v1697_v0 = vpop.f32.mrb[35].mxu1 }
 0xb7b   : > { %p1845_p3 = por %p1844_p2, %p1843_p1 }
 0xb7d   : > { %p1846_p5 = pnand %p1845_p3, %p1839_p0 }
 0xbea   : > { %v1254_v2 = vpop.permute.xlu1 %1253 }
 0xbeb   : > { %1257 = vst.msk [vmem:[#allocation4] sm:$0xff] %vm1256_vm6, %v1254_v2 }
 0xbf2   : > { %v1258_v3 = vld [vmem:[#allocation4] sm:$0xff] }
 0xbf3   : > { %v1259_v5 = vpack.c.bf16 %v1258_v3, %v1258_v3 }
 0xbf5   : > { %1715 = vmatmul.mubr.bf16.vlgmr.msra.gmra.mrb[8].mxu0 %v1259_v5 }
 0xcc8   : > { %v1358_v4 = vpop.f32.mrb[8].mxu0 }
 0xcc9   : > { %v1359_v6 = vadd.f32 %v1358_v4, %v2038_v1  ;;  %v1716_v7 = vpop.f32.mrb[9].mxu0 }
 0xcca   : > { %v1361_v8 = vpop.f32.mrb[10].mxu0 }
 0xccb   : > { %1364 = vst [vmem:[%s371_s27] sm:$0xff] %v1359_v6  ;;  %v1717_v9 = vpop.f32.mrb[11].mxu0 }
 0xccc   : > { %1849 = shalt.err (!%p1846_p5)
}
 0xccd   : > { %s1850_s25 = scalar_lea.hbm %s2288_s15, 128  ;;  %s1854_s27 = scalar_lea.hbm %s2344_s9, 256 }
 0xcce   : > { %p1851_p6 = scmp.ne.s32.totalorder %s2288_s15, %s1850_s25  ;;  %p1855_p10 = scmp.lt.u32.totalorder %s2288_s15, %s2344_s9 }
 0xccf   : > { %p1856_p11 = scmp.lt.u32.totalorder %s1854_s27, %s1850_s25  ;;  %p1858_p13 = scmp.lt.u32.totalorder %s1850_s25, %s2288_s15 }
 0xcd0   : > { %p1852_p7 = pnand %p1851_p6, %p2015_p4 }
 0xcd1   : > { %p1857_p12 = por %p1856_p11, %p1855_p10 }
 0xcd2   : > { %p1853_p9 = pneg %p1852_p7 }
 0xcd3   : > { %p1859_p0 = por %p1858_p13, %p1857_p12 }
 0xcd5   : > { %p1860_p1 = pnand %p1859_p0, %p1853_p9 }
 0xcd7   : > { %1863 = shalt.err (!%p1860_p1)
}
 0xcd8   : > { %1718 = dma.vmem_to_hbm [thread:$0]  (%p2015_p4), %s2290_s17, 128, %s2288_s15, %s1366_s12  }
 0xcd9 PF: > { %p1724_p2 = scmp.ge.s32.totalorder %s1914_s14, 2  ;;  %s1392_s16 = sand.u32 1, %s1894_s30  }
 0xcda   : > { %s1393_s18 = scalar_lea.sflag [#allocation6], %s1392_s16 }
 0xcdb   : > { %p1721_p3 = pnand %p1724_p2, %p2022_p8 }
 0xcdd   : > { %1889 = dma.done.wait (!%p1721_p3), %s1393_s18, 128  }
 0xcde   : > { %1891 = vsyncadd (!%p1721_p3), %s1393_s18, 4294967168  ;;  %s22_s14 = sadd.s32 1, %s1914_s14   ;;  %s2349_s19 = sld [smem:[#allocation8_spill]] }
 0xcdf   : > { %p19_p5 = scmp.ge.s32.totalorder %s22_s14, 4   ;;  %s2350_s30 = smov %s1898_s10 }
 0xce0   : > { %s2351_s10 = smov %s1902_s11  ;;  %s2352_s11 = smov %s2028_s22 }
 0xce1   : > { %s2353_s12 = smov %s1910_s13  ;;  %21 = sbr.rel (!%p19_p5) target bundleno = 4 (0x4), region = 101 }
 0xce4   : > { %s2354_s13 = smov %s2349_s19 }
 0xce8   :  { %1398 = vsyncpa [#allocation6], 1 }
 0xce9   :  { %1400 = vsyncpa [#allocation6 + $0x1], 1 }

// kernel: multi_head_attention4.1
= control target key start
LH: loop header
LB: loop body
LE: loop exit
PB: predicated region body
PF: predicated region fallthrough
CT: control target
= control target key end

     0   :  { %14 = vsyncpa [#allocation6], 0  ;;  %s2329_s0 = inlined_call_operand.vmem [shape: f32[2,8,128], index: 0, kind: input, shape index: {}]   ;;  %s2330_s1 = inlined_call_operand.vmem [shape: f32[2,8,128], index: 1, kind: input, shape index: {}]   ;;  %s2331_s2 = inlined_call_operand.vmem [shape: f32[2,8,128], index: 2, kind: input, shape index: {}]   ;;  %s2332_s3 = inlined_call_operand.vmem [shape: bf16[128,128], index: 3, kind: input, shape index: {}]   ;;  %s2333_s4 = inlined_call_operand.vmem [shape: bf16[128,128], index: 4, kind: input, shape index: {}]   ;;  %s2334_s5 = inlined_call_operand.vmem [shape: bf16[128,128], index: 5, kind: input, shape index: {}]   ;;  %s2335_s6 = inlined_call_operand.vmem [shape: bf16[128,128], index: 6, kind: input, shape index: {}]   ;;  %s2336_s7 = inlined_call_operand.vmem [shape: f32[1,128], index: 7, kind: input, shape index: {}]   ;;  %s2337_s8 = inlined_call_operand.vmem [shape: f32[1,128], index: 8, kind: input, shape index: {}]   ;;  %s2338_s9 = inlined_call_operand.hbm [shape: f32[2,8,128], index: 9, kind: output, shape index: {}]  }
   0x1   :  { %16 = vsyncpa [#allocation6 + $0x1], 0  ;;  %s1969_s30 = smov 0   ;;  %s1971_s10 = smov 0  }
   0x2   :  { %s1973_s11 = smov 0   ;;  %s1975_s12 = smov 0  }
   0x3   :  { %s1977_s13 = smov 0   ;;  %s1979_s14 = smov 0  }
   0x4 LB: > { %s1475_s15 = sadd.s32 4294967295, %s1908_s14   ;;  %s1476_s16 = sadd.s32 4294967294, %s1908_s14   ;;  %s1908_s14 = sphi %s1979_s14, %s22_s14   ;;  %s1904_s13 = sphi %s1977_s13, %s2348_s13   ;;  %s1900_s12 = sphi %s1975_s12, %s2347_s12   ;;  %s1896_s11 = sphi %s1973_s11, %s2346_s11   ;;  %s1892_s10 = sphi %s1971_s10, %s2345_s10   ;;  %s1888_s30 = sphi %s1969_s30, %s2344_s30  }
   0x5   : > { %s34_s17 = sadd.s32 1, %s1904_s13  ;;  %s249_s18 = sadd.s32 1, %s1896_s11 }
   0x6   : > { %p36_p0 = scmp.ge.s32.totalorder %s34_s17, 2  ;;  %p259_p1 = scmp.ne.s32.totalorder %s1896_s11, %s1892_s10 }
   0x7   : > { %p260_p2 = scmp.eq.s32.totalorder %s1475_s15, 1  ;;  %p265_p3 = scmp.ne.s32.totalorder %s1892_s10, %s1888_s30 }
   0x8   : > { %s2350_s17 = smov (%p36_p0, %s34_s17), 0  ;;  %p266_p5 = scmp.eq.s32.totalorder %s1476_s16, 1 }
   0x9   : > { %2340 = sst [smem:[#allocation8_spill]] %s2350_s17  ;;  %p2009_p4 = por %p260_p2, %p259_p1 }
   0xa   : > { %s244_s20 = ssub.s32 %s1904_s13, %s2350_s17  ;;  %p1479_p6 = scmp.ge.s32.totalorder %s1908_s14, 1 }
   0xb   : > { %p247_p7 = scmp.eq.s32.totalorder %s244_s20, 0  ;;  %p2016_p8 = por %p266_p5, %p265_p3 }
   0xc   : > { %p326_p9 = scmp.lt.s32.totalorder %s1908_s14, 3 }
   0xd   : > { %s2022_s22 = scalar_select %p247_p7, %s1896_s11, %s249_s18  }
   0xe   : > { %p327_p10 = pnand %p1479_p6, %p326_p9 }
   0xf   : > { %p372_p11 = scmp.lt.s32.totalorder (!%p327_p10), %s1900_s12, 1  ;;  %v1775_v3 = vld [vmem:[%s2333_s4] sm:$0xff] (!%p327_p10)   ;;  %v1910_v4 = vmov (!%p327_p10), 0.0   ;;  %v1776_v5 = vld [vmem:[%s2333_s4 + $0x8] sm:$0xff] (!%p327_p10)   ;;  %v1777_v6 = vld [vmem:[%s2333_s4 + $0x10] sm:$0xff] (!%p327_p10)   ;;  %v399_v7 = vlaneseq (!%p327_p10)  ;;  %vm1911_vm1 = vmmov (!%p327_p10), 0  }
  0x10   : > { %330 = sbr.rel (%p327_p10) target bundleno = 3289 (0xcd9), region = 56  ;;  %1584 = vmatprep.subr.bf16.mxu0 (!%p327_p10), %v1910_v4  ;;  %795 = vst [vmem:[#allocation4] sm:$0xff] (!%p327_p10), %v1910_v4  ;;  %1604 = vmatprep.subr.bf16.mxu1 (!%p327_p10), %v1910_v4  ;;  %v1778_v24 = vld [vmem:[%s2333_s4 + $0x18] sm:$0xff] (!%p327_p10)   ;;  %v1779_v25 = vld [vmem:[%s2333_s4 + $0x20] sm:$0xff] (!%p327_p10)   ;;  %v1780_v26 = vld [vmem:[%s2333_s4 + $0x28] sm:$0xff] (!%p327_p10)   ;;  %vm796_vm2 = vcmask (!%p327_p10), 64512  }
  0x11   : > { %1585 = vmatpush3.bf16.msra.mxu0 (!%p327_p10), %v1775_v3  ;;  %v400_v8 = vand.u32 (!%p327_p10), 127, %v399_v7  ;;  %1600 = vmatprep.mubr.msk.bf16.mxu0 (!%p327_p10), %vm1911_vm1, %v1910_v4  ;;  %v1781_v27 = vld [vmem:[%s2333_s4 + $0x30] sm:$0xff] (!%p327_p10)   ;;  %v1782_v28 = vld [vmem:[%s2333_s4 + $0x38] sm:$0xff] (!%p327_p10)   ;;  %v1791_v29 = vld [vmem:[%s2334_s5] sm:$0xff] (!%p327_p10)   ;;  %vm858_vm3 = vcmask (!%p327_p10), 1043456   ;;  %s1914_s17 = smov (!%p327_p10), 104  }
  0x12   : > { %1586 = vmatprep.subr.bf16.mxu0 (!%p327_p10), %v1910_v4  ;;  %1620 = vmatprep.mubr.msk.bf16.mxu1 (!%p327_p10), %vm1911_vm1, %v1910_v4  ;;  %v1792_v30 = vld [vmem:[%s2334_s5 + $0x8] sm:$0xff] (!%p327_p10)   ;;  %v1793_v31 = vld [vmem:[%s2334_s5 + $0x10] sm:$0xff] (!%p327_p10)   ;;  %v1794_v32 = vld [vmem:[%s2334_s5 + $0x18] sm:$0xff] (!%p327_p10)   ;;  %s1915_s28 = smov (!%p327_p10), 16   ;;  %s1916_s29 = smov (!%p327_p10), 8   ;;  %vm1024_vm4 = vcmask (!%p327_p10), 130112  }
  0x13   : > { %vm401_vm0 = vcmp.lt.s32.totalorder (!%p327_p10), %v400_v8, 32  ;;  %1605 = vmatpush3.bf16.msra.mxu1 (!%p327_p10), %v1791_v29  ;;  %v1795_v33 = vld [vmem:[%s2334_s5 + $0x20] sm:$0xff] (!%p327_p10)   ;;  %v1796_v34 = vld [vmem:[%s2334_s5 + $0x28] sm:$0xff] (!%p327_p10)   ;;  %v1797_v35 = vld [vmem:[%s2334_s5 + $0x30] sm:$0xff] (!%p327_p10)   ;;  %vm1140_vm5 = vcmask (!%p327_p10), 195712   ;;  %vm1256_vm6 = vcmask (!%p327_p10), 261312  }
  0x14   : > { %1606 = vmatprep.subr.bf16.mxu1 (!%p327_p10), %v1910_v4  ;;  %v1798_v36 = vld [vmem:[%s2334_s5 + $0x38] sm:$0xff] (!%p327_p10)   ;;  %v1530_v45 = vld [vmem:[%s2336_s7] ss:$0 sm:$0xff] (!%p327_p10)  ;;  %v1784_v56 = vld [vmem:[%s2332_s3 + $0x8] sm:$0xff] (!%p327_p10)   ;;  %s369_s25 = sand.u32 (!%p327_p10), 1, %s1892_s10   ;;  %s1918_s18 = smov (!%p327_p10), [#allocation5]  }
  0x15   : > { %1587 = vmatpush3.bf16.msra.mxu0 (!%p327_p10), %v1776_v5  ;;  %v1531_v47 = vld [vmem:[%s2337_s8] ss:$0 sm:$0xff] (!%p327_p10)  ;;  %v1785_v59 = vld [vmem:[%s2332_s3 + $0x10] sm:$0xff] (!%p327_p10)   ;;  %v1786_v61 = vld [vmem:[%s2332_s3 + $0x18] sm:$0xff] (!%p327_p10)   ;;  %s1480_s26 = sshll.u32 (!%p327_p10), %s369_s25, 3 }
  0x16   : > { %1588 = vmatprep.subr.bf16.mxu0 (!%p327_p10), %v1910_v4  ;;  %v1783_v51 = vld [vmem:[%s2332_s3] sm:$0xff] (!%p327_p10)   ;;  %v1789_v3 = vld [vmem:[%s2332_s3 + $0x30] sm:$0xff] (!%p327_p10)  }
  0x17   : > { %s373_s23 = scalar_select %p372_p11, %s1900_s12, 1  ;;  %1607 = vmatpush3.bf16.msra.mxu1 %v1792_v30  ;;  %v1787_v62 = vld [vmem:[%s2332_s3 + $0x20] sm:$0xff]  }
  0x18   : > { %1608 = vmatprep.subr.bf16.mxu1 %v1910_v4 }
  0x19   : > { %s1481_s24 = sshll.u32 %s373_s23, 3  ;;  %1589 = vmatpush3.bf16.msra.mxu0 %v1777_v6  ;;  %v1790_v6 = vld [vmem:[%s2332_s3 + $0x38] sm:$0xff]   ;;  %s1917_s23 = smov 24  }
  0x1a   : > { %s382_s27 = scalar_lea.vmem %s2330_s1, %s1481_s24  ;;  %s378_s15 = scalar_lea.vmem %s2329_s0, %s1481_s24  ;;  %1590 = vmatprep.subr.bf16.mxu0 %v1910_v4 }
  0x1b   : > { %v394_v0 = vld [vmem:[%s382_s27] sm:$0xff]  ;;  %s386_s20 = scalar_lea.vmem %s2331_s2, %s1481_s24  ;;  %1609 = vmatpush3.bf16.msra.mxu1 %v1793_v31  ;;  %s1912_s24 = smov 120  }
  0x1c   : > { %395 = vadd.xlane.f32.xlu0 %v394_v0  ;;  %v2032_v1 = vld [vmem:[%s378_s15] sm:$0xff]  ;;  %1610 = vmatprep.subr.bf16.mxu1 %v1910_v4  ;;  %s1913_s27 = smov 112  }
  0x1d   : > { %v427_v2 = vld [vmem:[%s386_s20] sm:$0xff]  ;;  %1591 = vmatpush3.bf16.msra.mxu0 %v1778_v24  ;;  %s1834_s20 = sshll.u32 %s1918_s18, 4  ;;  %s1835_s20 = int_to_ptr.vmem [resolvable:$false] %s1834_s20 }
  0x1e   : > { %1592 = vmatprep.subr.bf16.mxu0 %v1910_v4 }
  0x1f   : > { %1611 = vmatpush3.bf16.msra.mxu1 %v1794_v32 }
  0x20   : > { %656 = vadd.xlane.f32.xlu0 %v2032_v1  ;;  %1612 = vmatprep.subr.bf16.mxu1 %v1910_v4 }
  0x21   : > { %1593 = vmatpush3.bf16.msra.mxu0 %v1779_v25 }
  0x22   : > { %1594 = vmatprep.subr.bf16.mxu0 %v1910_v4 }
  0x23   : > { %1613 = vmatpush3.bf16.msra.mxu1 %v1795_v33 }
  0x24   : > { %428 = vadd.xlane.f32.xlu0 %v427_v2  ;;  %1614 = vmatprep.subr.bf16.mxu1 %v1910_v4 }
  0x25   : > { %1595 = vmatpush3.bf16.msra.mxu0 %v1780_v26 }
  0x26   : > { %1596 = vmatprep.subr.bf16.mxu0 %v1910_v4 }
  0x27   : > { %1615 = vmatpush3.bf16.msra.mxu1 %v1796_v34 }
  0x28   : > { %1616 = vmatprep.subr.bf16.mxu1 %v1910_v4 }
  0x29   : > { %1597 = vmatpush3.bf16.msra.mxu0 %v1781_v27 }
  0x2a   : > { %1598 = vmatprep.subr.bf16.mxu0 %v1910_v4 }
  0x2b   : > { %1617 = vmatpush3.bf16.msra.mxu1 %v1797_v35 }
  0x2c   : > { %1618 = vmatprep.subr.bf16.mxu1 %v1910_v4 }
  0x2d   : > { %1599 = vmatpush3.bf16.msra.mxu0 %v1782_v28 }
  0x2e   : > { %1624 = vmatprep.subr.bf16.mxu0 %v1910_v4 }
  0x2f   : > { %1619 = vmatpush3.bf16.msra.mxu1 %v1798_v36 }
  0x30   : > { %1644 = vmatprep.subr.bf16.mxu1 %v1910_v4 }
  0xa9   : > { %v396_v9 = vpop.xlane.xlu0 %395 }
  0xaa   : > { %v397_v10 = vmul.f32 0.03125, %v396_v9 }
  0xac   : > { %v398_v11 = vsub.f32 %v394_v0, %v397_v10  ;;  %v1788_v0 = vld [vmem:[%s2332_s3 + $0x28] sm:$0xff]  }
  0xad   : > { %v657_v12 = vpop.xlane.xlu0 %656 }
  0xae   : > { %v658_v13 = vmul.f32 0.03125, %v657_v12  ;;  %v2053_v14 = vsel %vm401_vm0, %v398_v11, 0.0 }
  0xaf   : > { %v405_v15 = vmul.f32 %v2053_v14, %v2053_v14 }
  0xb0   : > { %v659_v16 = vsub.f32 %v2032_v1, %v658_v13 }
  0xb1   : > { %406 = vadd.xlane.f32.xlu1 %v405_v15  ;;  %v429_v17 = vpop.xlane.xlu0 %428 }
  0xb2   : > { %v2058_v18 = vsel %vm401_vm0, %v659_v16, 0.0  ;;  %v430_v19 = vmul.f32 0.03125, %v429_v17 }
  0xb3   : > { %v666_v20 = vmul.f32 %v2058_v18, %v2058_v18 }
  0xb4   : > { %v431_v21 = vsub.f32 %v427_v2, %v430_v19 }
  0xb5   : > { %667 = vadd.xlane.f32.xlu1 %v666_v20 }
  0xb6   : > { %v2062_v22 = vsel %vm401_vm0, %v431_v21, 0.0 }
  0xb7   : > { %v433_v23 = vmul.f32 %v2062_v22, %v2062_v22 }
  0xb9   : > { %434 = vadd.xlane.f32.xlu1 %v433_v23 }
 0x13e   : > { %v407_v37 = vpop.xlane.xlu1 %406 }
 0x13f   : > { %v408_v38 = vmul.f32 0.03125, %v407_v37 }
 0x141   : > { %v409_v39 = vadd.f32 1e-06, %v408_v38 }
 0x142   : > { %v668_v40 = vpop.xlane.xlu1 %667 }
 0x143   : > { %1808 = vrsqrt.f32 %v409_v39  ;;  %v669_v50 = vmul.f32 0.03125, %v668_v40 }
 0x145   : > { %v670_v55 = vadd.f32 1e-06, %v669_v50 }
 0x146   : > { %v435_v41 = vpop.xlane.xlu1 %434 }
 0x147   : > { %v436_v42 = vmul.f32 0.03125, %v435_v41 }
 0x149   : > { %v437_v43 = vadd.f32 1e-06, %v436_v42 }
 0x14b   : > { %1810 = vrsqrt.f32 %v437_v43 }
 0x14c   : > { %1812 = vrsqrt.f32 %v670_v55 }
 0x14d   : > { %v1809_v44 = vpop.eup %1808 }
 0x14e   : > { %v411_v46 = vmul.f32 %v1809_v44, %v2053_v14 }
 0x150   : > { %v418_v48 = vmul.f32 %v1530_v45, %v411_v46 }
 0x152   : > { %v425_v49 = vadd.f32 %v1531_v47, %v418_v48 }
 0x154   : > { %v426_v52 = vpack.c.bf16 %v425_v49, %v425_v49 }
 0x155   : > { %v1811_v53 = vpop.eup %1810 }
 0x156   : > { %1601 = vmatmul.mubr.bf16.vlgmr.msra.gmra.mrb[0].mxu0 %v426_v52  ;;  %v439_v54 = vmul.f32 %v1811_v53, %v2062_v22  ;;  %v1813_v63 = vpop.eup %1812 }
 0x157   : > { %1625 = vmatpush3.bf16.msra.mxu0 %v1783_v51  ;;  %1640 = vmatprep.mubr.msk.bf16.mxu0 %vm1911_vm1, %v1910_v4  ;;  %v672_v2 = vmul.f32 %v1813_v63, %v2058_v18 }
 0x158   : > { %1626 = vmatprep.subr.bf16.mxu0 %v1910_v4  ;;  %v440_v57 = vmul.f32 %v1530_v45, %v439_v54 }
 0x159   : > { %v679_v5 = vmul.f32 %v1530_v45, %v672_v2 }
 0x15a   : > { %v441_v58 = vadd.f32 %v1531_v47, %v440_v57 }
 0x15b   : > { %1627 = vmatpush3.bf16.msra.mxu0 %v1784_v56  ;;  %v686_v7 = vadd.f32 %v1531_v47, %v679_v5 }
 0x15c   : > { %1628 = vmatprep.subr.bf16.mxu0 %v1910_v4  ;;  %v442_v60 = vpack.c.bf16 %v441_v58, %v441_v58 }
 0x15d   : > { %v687_v8 = vpack.c.bf16 %v686_v7, %v686_v7 }
 0x15e   : > { %1621 = vmatmul.mubr.bf16.vlgmr.msra.gmra.mrb[0].mxu1 %v442_v60 }
 0x15f   : > { %1629 = vmatpush3.bf16.msra.mxu0 %v1785_v59  ;;  %1646 = vmatprep.mubr.msk.bf16.mxu1 %vm1911_vm1, %v1910_v4 }
 0x160   : > { %1630 = vmatprep.subr.bf16.mxu0 %v1910_v4 }
 0x163   : > { %1631 = vmatpush3.bf16.msra.mxu0 %v1786_v61 }
 0x164   : > { %1632 = vmatprep.subr.bf16.mxu0 %v1910_v4 }
 0x167   : > { %1633 = vmatpush3.bf16.msra.mxu0 %v1787_v62 }
 0x168   : > { %1634 = vmatprep.subr.bf16.mxu0 %v1910_v4 }
 0x16b   : > { %1635 = vmatpush3.bf16.msra.mxu0 %v1788_v0 }
 0x16c   : > { %1636 = vmatprep.subr.bf16.mxu0 %v1910_v4 }
 0x16f   : > { %1637 = vmatpush3.bf16.msra.mxu0 %v1789_v3 }
 0x170   : > { %1638 = vmatprep.subr.bf16.mxu0 %v1910_v4 }
 0x173   : > { %1639 = vmatpush3.bf16.msra.mxu0 %v1790_v6 }
 0x174   : > { %1692 = vmatprep.subr.bf16.mxu0 %v1910_v4 }
 0x176   : > { %1641 = vmatmul.mubr.bf16.vlgmr.msra.gmra.mrb[4].mxu0 %v687_v8 }
 0x177   : > { %1708 = vmatprep.mubr.msk.bf16.mxu0 %vm1911_vm1, %v1910_v4 }
 0x229   : > { %v541_v9 = vpop.f32.mrb[0].mxu0 }
 0x22a   : > { %v547_v10 = vpack.c.bf16 %v541_v9, %v541_v9  ;;  %v1602_v11 = vpop.f32.mrb[1].mxu0 }
 0x22b   : > { %v544_v12 = vpop.f32.mrb[2].mxu0 }
 0x22c   : > { %548 = vst [vmem:[#allocation2] sm:$0xf] %v547_v10  ;;  %v1603_v13 = vpop.f32.mrb[3].mxu0 }
 0x231   : > { %v647_v14 = vpop.f32.mrb[0].mxu1 }
 0x232   : > { %v653_v15 = vpack.c.bf16 %v647_v14, %v647_v14  ;;  %v1622_v16 = vpop.f32.mrb[1].mxu1 }
 0x233   : > { %v793_v17 = vld [vmem:[#allocation2] sm:$0xf]  ;;  %v650_v18 = vpop.f32.mrb[2].mxu1 }
 0x234   : > { %v801_v19 = vsel %vm796_vm2, %v793_v17, 0  ;;  %654 = vst [vmem:[#allocation3] sm:$0xf] %v653_v15  ;;  %v1623_v20 = vpop.f32.mrb[3].mxu1  ;;  %v2183_v33 = vcombine.low %v793_v17, %v793_v17 }
 0x235   : > { %1645 = vmatpush3.bf16.xpose.msra.mxu1 %v801_v19 }
 0x236   : > { %1650 = vmatprep.subr.bf16.mxu1 %v1910_v4 }
 0x23b   : > { %v2171_v21 = vld [vmem:[#allocation3] sm:$0xf] }
 0x23c   : > { %v860_v25 = vsel %vm858_vm3, %v2171_v21, 0  ;;  %v2207_v60 = vcombine.low %v2171_v21, %v2171_v21 }
 0x249   : > { %v786_v22 = vpop.f32.mrb[4].mxu0 }
 0x24a   : > { %v2173_v23 = vpack.c.bf16 %v786_v22, %v786_v22  ;;  %v1642_v24 = vpop.f32.mrb[5].mxu0 }
 0x24b   : > { %v789_v26 = vpop.f32.mrb[6].mxu0 }
 0x24c   : > { %v1643_v27 = vpop.f32.mrb[7].mxu0  ;;  %1647 = vmatmul.mubr.msk.bf16.vlgmr.msra.gmra.mrb[4].mxu1 %vm796_vm2, %v2173_v23 }
 0x24d   : > { %1651 = vmatpush3.bf16.msra.mxu1 %v860_v25  ;;  %1652 = vmatprep.mubr.msk.bf16.mxu1 %vm1911_vm1, %v1910_v4 }
 0x24e   : > { %1656 = vmatprep.subr.bf16.mxu1 %v1910_v4 }
 0x31f   : > { %v837_v28 = vpop.f32.mrb[4].mxu1 }
 0x320   : > { %v1648_v29 = vpop.f32.mrb[5].mxu1  ;;  %v843_v30 = vsel %vm796_vm2, %v837_v28, -inf }
 0x321   : > { %844 = vmax.xlane.f32.xlu0 %v843_v30  ;;  %v840_v31 = vpop.f32.mrb[6].mxu1 }
 0x322   : > { %v1649_v32 = vpop.f32.mrb[7].mxu1 }
 0x337   : > { %909 = vrot.lane.b32.xlu0 %v2183_v33, %s1912_s24 }
 0x3ae   : > { %v845_v34 = vpop.xlane.xlu0 %844 }
 0x3af   : > { %v846_v35 = vsub.f32 %v837_v28, %v845_v34 }
 0x3b1   : > { %v847_v36 = vmul.f32 1.442695, %v846_v35 }
 0x3b2   : > { %v910_v42 = vpop.permute.xlu0 %909 }
 0x3b3   : > { %1814 = vpow2.f32 %v847_v36  ;;  %v915_v44 = vsel %vm796_vm2, %v910_v42, 0 }
 0x3bd   : > { %v1815_v37 = vpop.eup %1814 }
 0x3be   : > { %v849_v38 = vsel %vm796_vm2, %v1815_v37, 0.0 }
 0x3bf   : > { %850 = vadd.xlane.f32.xlu1 %v849_v38 }
 0x3d0   : > { %904 = vrot.lane.b32.xlu1 %v2173_v23, %s1912_s24 }
 0x44c   : > { %v851_v39 = vpop.xlane.xlu1 %850 }
 0x44d   : > { %1816 = vrcp.f32 %v851_v39 }
 0x450   : > { %v905_v45 = vpop.permute.xlu1 %904 }
 0x457   : > { %v1817_v40 = vpop.eup %1816 }
 0x458   : > { %v853_v41 = vmul.f32 %v1817_v40, %v1815_v37 }
 0x45a   : > { %v854_v43 = vpack.c.bf16 %v853_v41, %v853_v41 }
 0x45c   : > { %1653 = vmatmul.mubr.msk.bf16.vlgmr.msra.gmra.mrb[8].mxu1 %vm796_vm2, %v854_v43 }
 0x45d   : > { %1657 = vmatpush3.bf16.xpose.msra.mxu1 %v915_v44  ;;  %1658 = vmatprep.mubr.msk.bf16.mxu1 %vm1911_vm1, %v1910_v4 }
 0x45e   : > { %1662 = vmatprep.subr.bf16.mxu1 %v1910_v4 }
 0x464   : > { %1659 = vmatmul.mubr.msk.bf16.vlgmr.msra.gmra.mrb[12].mxu1 %vm796_vm2, %v905_v45 }
 0x465   : > { %1664 = vmatprep.mubr.msk.bf16.mxu1 %vm1911_vm1, %v1910_v4 }
 0x52f   : > { %v896_v46 = vpop.f32.mrb[8].mxu1 }
 0x530   : > { %902 = vst.msk [vmem:[#allocation4] sm:$0xff] %vm796_vm2, %v896_v46  ;;  %v1654_v47 = vpop.f32.mrb[9].mxu1 }
 0x531   : > { %v899_v48 = vpop.f32.mrb[10].mxu1 }
 0x532   : > { %v1655_v49 = vpop.f32.mrb[11].mxu1 }
 0x537   : > { %v951_v50 = vpop.f32.mrb[12].mxu1 }
 0x538   : > { %v1660_v51 = vpop.f32.mrb[13].mxu1  ;;  %v957_v52 = vsel %vm796_vm2, %v951_v50, -inf }
 0x539   : > { %958 = vmax.xlane.f32.xlu1 %v957_v52  ;;  %v954_v53 = vpop.f32.mrb[14].mxu1 }
 0x53a   : > { %v1661_v54 = vpop.f32.mrb[15].mxu1  ;;  %v1800_v53 = vld [vmem:[%s2335_s6] sm:$0xff]  }
 0x53b   : > { %1693 = vmatpush3.bf16.msra.mxu0 %v1800_v53  ;;  %v1801_v54 = vld [vmem:[%s2335_s6 + $0x8] sm:$0xff]  }
 0x53c   : > { %1694 = vmatprep.subr.bf16.mxu0 %v1910_v4 }
 0x53f   : > { %1695 = vmatpush3.bf16.msra.mxu0 %v1801_v54 }
 0x540   : > { %1696 = vmatprep.subr.bf16.mxu0 %v1910_v4 }
 0x54a   : > { %1028 = vrot.lane.b32.xlu1 %v2183_v33, %s1913_s27 }
 0x54e   : > { %1026 = vrot.lane.b32.xlu1 %v2173_v23, %s1913_s27 }
 0x5c6   : > { %v959_v55 = vpop.xlane.xlu1 %958 }
 0x5c7   : > { %v960_v56 = vsub.f32 %v951_v50, %v959_v55  ;;  %v1802_v55 = vld [vmem:[%s2335_s6 + $0x10] sm:$0xff]  }
 0x5c8   : > { %1697 = vmatpush3.bf16.msra.mxu0 %v1802_v55 }
 0x5c9   : > { %v961_v57 = vmul.f32 1.442695, %v960_v56  ;;  %v1803_v56 = vld [vmem:[%s2335_s6 + $0x18] sm:$0xff]   ;;  %1698 = vmatprep.subr.bf16.mxu0 %v1910_v4 }
 0x5ca   : > { %v1029_v3 = vpop.permute.xlu1 %1028 }
 0x5cb   : > { %1818 = vpow2.f32 %v961_v57  ;;  %v1034_v6 = vsel %vm796_vm2, %v1029_v3, 0  ;;  %v1804_v57 = vld [vmem:[%s2335_s6 + $0x20] sm:$0xff]  }
 0x5cc   : > { %1699 = vmatpush3.bf16.msra.mxu0 %v1803_v56 }
 0x5cd   : > { %1700 = vmatprep.subr.bf16.mxu0 %v1910_v4 }
 0x5ce   : > { %v1027_v7 = vpop.permute.xlu1 %1026 }
 0x5d0   : > { %1701 = vmatpush3.bf16.msra.mxu0 %v1804_v57 }
 0x5d1   : > { %1702 = vmatprep.subr.bf16.mxu0 %v1910_v4 }
 0x5d5   : > { %v1819_v58 = vpop.eup %1818 }
 0x5d6   : > { %v963_v59 = vsel %vm796_vm2, %v1819_v58, 0.0 }
 0x5d7   : > { %964 = vadd.xlane.f32.xlu0 %v963_v59  ;;  %v1806_v59 = vld [vmem:[%s2335_s6 + $0x30] sm:$0xff]  }
 0x5ed   : > { %972 = vrot.lane.b32.xlu0 %v2207_v60, %s1912_s24  ;;  %s1527_s24 = sshll.u32 %s1900_s12, 7  ;;  %s1366_s12 = scalar_lea.sflag [#allocation6], %s369_s25 }
 0x5ee   : > { %s2282_s15 = scalar_lea.hbm %s2338_s9, %s1527_s24 }
 0x664   : > { %v965_v61 = vpop.xlane.xlu0 %964 }
 0x665   : > { %1820 = vrcp.f32 %v965_v61 }
 0x668   : > { %v973_v62 = vpop.permute.xlu0 %972 }
 0x669   : > { %v978_v63 = vsel %vm858_vm3, %v973_v62, 0 }
 0x66a   : > { %1663 = vmatpush3.bf16.msra.mxu1 %v978_v63 }
 0x66b   : > { %1668 = vmatprep.subr.bf16.mxu1 %v1910_v4 }
 0x66f   : > { %v1821_v0 = vpop.eup %1820 }
 0x670   : > { %v967_v2 = vmul.f32 %v1821_v0, %v1819_v58  ;;  %v1805_v58 = vld [vmem:[%s2335_s6 + $0x28] sm:$0xff]  }
 0x671   : > { %1703 = vmatpush3.bf16.msra.mxu0 %v1805_v58 }
 0x672   : > { %v968_v5 = vpack.c.bf16 %v967_v2, %v967_v2  ;;  %1704 = vmatprep.subr.bf16.mxu0 %v1910_v4 }
 0x674   : > { %1665 = vmatmul.mubr.msk.bf16.vlgmr.msra.gmra.mrb[16].mxu1 %vm796_vm2, %v968_v5 }
 0x675   : > { %1669 = vmatpush3.bf16.xpose.msra.mxu1 %v1034_v6  ;;  %1670 = vmatprep.mubr.msk.bf16.mxu1 %vm1911_vm1, %v1910_v4 }
 0x676   : > { %1674 = vmatprep.subr.bf16.mxu1 %v1910_v4  ;;  %1705 = vmatpush3.bf16.msra.mxu0 %v1806_v59 }
 0x677   : > { %1706 = vmatprep.subr.bf16.mxu0 %v1910_v4 }
 0x67c   : > { %1671 = vmatmul.mubr.msk.bf16.vlgmr.msra.gmra.mrb[20].mxu1 %vm796_vm2, %v1027_v7 }
 0x67d   : > { %1676 = vmatprep.mubr.msk.bf16.mxu1 %vm1911_vm1, %v1910_v4 }
 0x747   : > { %v1014_v8 = vpop.f32.mrb[16].mxu1 }
 0x748   : > { %v1666_v9 = vpop.f32.mrb[17].mxu1 }
 0x749   : > { %v1017_v10 = vpop.f32.mrb[18].mxu1 }
 0x74a   : > { %v1667_v11 = vpop.f32.mrb[19].mxu1 }
 0x74f   : > { %v1070_v12 = vpop.f32.mrb[20].mxu1 }
 0x750   : > { %v1672_v13 = vpop.f32.mrb[21].mxu1  ;;  %v1076_v14 = vsel %vm796_vm2, %v1070_v12, -inf }
 0x751   : > { %1077 = vmax.xlane.f32.xlu1 %v1076_v14  ;;  %v1073_v15 = vpop.f32.mrb[22].mxu1 }
 0x752   : > { %v1673_v16 = vpop.f32.mrb[23].mxu1 }
 0x762   : > { %1144 = vrot.lane.b32.xlu1 %v2183_v33, %s1914_s17 }
 0x766   : > { %1142 = vrot.lane.b32.xlu1 %v2173_v23, %s1914_s17 }
 0x7de   : > { %v1078_v17 = vpop.xlane.xlu1 %1077 }
 0x7df   : > { %v1079_v18 = vsub.f32 %v1070_v12, %v1078_v17 }
 0x7e1   : > { %v1080_v19 = vmul.f32 1.442695, %v1079_v18 }
 0x7e2   : > { %v1145_v27 = vpop.permute.xlu1 %1144 }
 0x7e3   : > { %1822 = vpow2.f32 %v1080_v19  ;;  %v1150_v29 = vsel %vm796_vm2, %v1145_v27, 0 }
 0x7e6   : > { %v1143_v30 = vpop.permute.xlu1 %1142 }
 0x7ed   : > { %v1823_v20 = vpop.eup %1822 }
 0x7ee   : > { %v1082_v21 = vsel %vm796_vm2, %v1823_v20, 0.0 }
 0x7ef   : > { %1083 = vadd.xlane.f32.xlu0 %v1082_v21 }
 0x805   : > { %1088 = vrot.lane.b32.xlu0 %v2207_v60, %s1913_s27  ;;  %s371_s27 = scalar_lea.vmem [#allocation5], %s1480_s26 }
 0x87c   : > { %v1084_v22 = vpop.xlane.xlu0 %1083 }
 0x87d   : > { %1824 = vrcp.f32 %v1084_v22 }
 0x880   : > { %v1089_v24 = vpop.permute.xlu0 %1088 }
 0x881   : > { %v1094_v25 = vsel %vm858_vm3, %v1089_v24, 0 }
 0x882   : > { %1675 = vmatpush3.bf16.msra.mxu1 %v1094_v25 }
 0x883   : > { %1680 = vmatprep.subr.bf16.mxu1 %v1910_v4 }
 0x887   : > { %v1825_v23 = vpop.eup %1824 }
 0x888   : > { %v1086_v26 = vmul.f32 %v1825_v23, %v1823_v20 }
 0x88a   : > { %v1087_v28 = vpack.c.bf16 %v1086_v26, %v1086_v26 }
 0x88c   : > { %1677 = vmatmul.mubr.msk.bf16.vlgmr.msra.gmra.mrb[24].mxu1 %vm796_vm2, %v1087_v28 }
 0x88d   : > { %1681 = vmatpush3.bf16.xpose.msra.mxu1 %v1150_v29  ;;  %1682 = vmatprep.mubr.msk.bf16.mxu1 %vm1911_vm1, %v1910_v4 }
 0x88e   : > { %1686 = vmatprep.subr.bf16.mxu1 %v1910_v4 }
 0x894   : > { %1683 = vmatmul.mubr.msk.bf16.vlgmr.msra.gmra.mrb[28].mxu1 %vm796_vm2, %v1143_v30 }
 0x895   : > { %1688 = vmatprep.mubr.msk.bf16.mxu1 %vm1911_vm1, %v1910_v4 }
 0x95f   : > { %v1130_v31 = vpop.f32.mrb[24].mxu1 }
 0x960   : > { %v1678_v32 = vpop.f32.mrb[25].mxu1 }
 0x961   : > { %v1133_v33 = vpop.f32.mrb[26].mxu1 }
 0x962   : > { %v1679_v34 = vpop.f32.mrb[27].mxu1 }
 0x967   : > { %v1186_v35 = vpop.f32.mrb[28].mxu1 }
 0x968   : > { %v1684_v36 = vpop.f32.mrb[29].mxu1  ;;  %v1192_v37 = vsel %vm796_vm2, %v1186_v35, -inf }
 0x969   : > { %1193 = vmax.xlane.f32.xlu0 %v1192_v37  ;;  %v1189_v38 = vpop.f32.mrb[30].mxu1 }
 0x96a   : > { %v1685_v39 = vpop.f32.mrb[31].mxu1 }
 0x97f   : > { %1204 = vrot.lane.b32.xlu0 %v2207_v60, %s1914_s17  ;;  %v1807_v60 = vld [vmem:[%s2335_s6 + $0x38] sm:$0xff]   ;;  %s1380_s17 = sshll.u32 %s371_s27, 4  ;;  %s2284_s17 = int_to_ptr.vmem [resolvable:$true] %s1380_s17 }
 0x980   : > { %1707 = vmatpush3.bf16.msra.mxu0 %v1807_v60  ;;  %s1830_s16 = scalar_lea.vmem %s2284_s17, 128  ;;  %p1837_p1 = scmp.lt.s32.totalorder %s2284_s17, %s1835_s20 }
 0x981   : > { %p1831_p12 = scmp.ne.s32.totalorder %s2284_s17, %s1830_s16 }
 0x983   : > { %1137 = vrot.lane.b32.xlu0 %v1130_v31, %s1915_s28  ;;  %p1832_p13 = pnand %p1831_p12, %p2009_p4 }
 0x985   : > { %p1833_p0 = pneg %p1832_p13 }
 0x9f6   : > { %v1194_v40 = vpop.xlane.xlu0 %1193 }
 0x9f7   : > { %v1195_v41 = vsub.f32 %v1186_v35, %v1194_v40 }
 0x9f9   : > { %v1196_v42 = vmul.f32 1.442695, %v1195_v41 }
 0x9fa   : > { %v1205_v43 = vpop.permute.xlu0 %1204 }
 0x9fb   : > { %1826 = vpow2.f32 %v1196_v42  ;;  %v1210_v44 = vsel %vm858_vm3, %v1205_v43, 0 }
 0x9fc   : > { %1687 = vmatpush3.bf16.msra.mxu1 %v1210_v44 }
 0x9fe   : > { %v1138_v49 = vpop.permute.xlu0 %1137 }
 0xa05   : > { %v1827_v45 = vpop.eup %1826 }
 0xa06   : > { %v1198_v46 = vsel %vm796_vm2, %v1827_v45, 0.0 }
 0xa07   : > { %1199 = vadd.xlane.f32.xlu1 %v1198_v46 }
 0xa18   : > { %1021 = vrot.lane.b32.xlu1 %v1014_v8, %s1916_s29 }
 0xa94   : > { %v1200_v47 = vpop.xlane.xlu1 %1199 }
 0xa95   : > { %1828 = vrcp.f32 %v1200_v47 }
 0xa98   : > { %v1022_v48 = vpop.permute.xlu1 %1021 }
 0xa99   : > { %1025 = vst.msk [vmem:[#allocation4] sm:$0xff] %vm1024_vm4, %v1022_v48 }
 0xa9a   : > { %1141 = vst.msk [vmem:[#allocation4] sm:$0xff] %vm1140_vm5, %v1138_v49 }
 0xa9f   : > { %v1829_v50 = vpop.eup %1828 }
 0xaa0   : > { %v1202_v51 = vmul.f32 %v1829_v50, %v1827_v45 }
 0xaa2   : > { %v1203_v52 = vpack.c.bf16 %v1202_v51, %v1202_v51 }
 0xaa4   : > { %1689 = vmatmul.mubr.msk.bf16.vlgmr.msra.gmra.mrb[32].mxu1 %vm796_vm2, %v1203_v52 }
 0xb77   : > { %v1246_v61 = vpop.f32.mrb[32].mxu1 }
 0xb78   : > { %1253 = vrot.lane.b32.xlu1 %v1246_v61, %s1917_s23  ;;  %v1690_v62 = vpop.f32.mrb[33].mxu1  ;;  %s1836_s23 = scalar_lea.vmem %s1835_s20, 256 }
 0xb79   : > { %v1249_v63 = vpop.f32.mrb[34].mxu1  ;;  %p1838_p2 = scmp.lt.s32.totalorder %s1836_s23, %s1830_s16 }
 0xb7a   : > { %v1691_v0 = vpop.f32.mrb[35].mxu1 }
 0xb7b   : > { %p1839_p3 = por %p1838_p2, %p1837_p1 }
 0xb7d   : > { %p1840_p5 = pnand %p1839_p3, %p1833_p0 }
 0xbea   : > { %v1254_v2 = vpop.permute.xlu1 %1253 }
 0xbeb   : > { %1257 = vst.msk [vmem:[#allocation4] sm:$0xff] %vm1256_vm6, %v1254_v2 }
 0xbf2   : > { %v1258_v3 = vld [vmem:[#allocation4] sm:$0xff] }
 0xbf3   : > { %v1259_v5 = vpack.c.bf16 %v1258_v3, %v1258_v3 }
 0xbf5   : > { %1709 = vmatmul.mubr.bf16.vlgmr.msra.gmra.mrb[8].mxu0 %v1259_v5 }
 0xcc8   : > { %v1358_v4 = vpop.f32.mrb[8].mxu0 }
 0xcc9   : > { %v1359_v6 = vadd.f32 %v1358_v4, %v2032_v1  ;;  %v1710_v7 = vpop.f32.mrb[9].mxu0 }
 0xcca   : > { %v1361_v8 = vpop.f32.mrb[10].mxu0 }
 0xccb   : > { %1364 = vst [vmem:[%s371_s27] sm:$0xff] %v1359_v6  ;;  %v1711_v9 = vpop.f32.mrb[11].mxu0 }
 0xccc   : > { %1843 = shalt.err (!%p1840_p5)
}
 0xccd   : > { %s1844_s25 = scalar_lea.hbm %s2282_s15, 128  ;;  %s1848_s27 = scalar_lea.hbm %s2338_s9, 256 }
 0xcce   : > { %p1845_p6 = scmp.ne.s32.totalorder %s2282_s15, %s1844_s25  ;;  %p1849_p10 = scmp.lt.u32.totalorder %s2282_s15, %s2338_s9 }
 0xccf   : > { %p1850_p11 = scmp.lt.u32.totalorder %s1848_s27, %s1844_s25  ;;  %p1852_p13 = scmp.lt.u32.totalorder %s1844_s25, %s2282_s15 }
 0xcd0   : > { %p1846_p7 = pnand %p1845_p6, %p2009_p4 }
 0xcd1   : > { %p1851_p12 = por %p1850_p11, %p1849_p10 }
 0xcd2   : > { %p1847_p9 = pneg %p1846_p7 }
 0xcd3   : > { %p1853_p0 = por %p1852_p13, %p1851_p12 }
 0xcd5   : > { %p1854_p1 = pnand %p1853_p0, %p1847_p9 }
 0xcd7   : > { %1857 = shalt.err (!%p1854_p1)
}
 0xcd8   : > { %1712 = dma.vmem_to_hbm [thread:$0]  (%p2009_p4), %s2284_s17, 128, %s2282_s15, %s1366_s12  }
 0xcd9 PF: > { %p1718_p2 = scmp.ge.s32.totalorder %s1908_s14, 2  ;;  %s1392_s16 = sand.u32 1, %s1888_s30  }
 0xcda   : > { %s1393_s18 = scalar_lea.sflag [#allocation6], %s1392_s16 }
 0xcdb   : > { %p1715_p3 = pnand %p1718_p2, %p2016_p8 }
 0xcdd   : > { %1883 = dma.done.wait (!%p1715_p3), %s1393_s18, 128  }
 0xcde   : > { %1885 = vsyncadd (!%p1715_p3), %s1393_s18, 4294967168  ;;  %s22_s14 = sadd.s32 1, %s1908_s14   ;;  %s2343_s19 = sld [smem:[#allocation8_spill]] }
 0xcdf   : > { %p19_p5 = scmp.ge.s32.totalorder %s22_s14, 4   ;;  %s2344_s30 = smov %s1892_s10 }
 0xce0   : > { %s2345_s10 = smov %s1896_s11  ;;  %s2346_s11 = smov %s2022_s22 }
 0xce1   : > { %s2347_s12 = smov %s1904_s13  ;;  %21 = sbr.rel (!%p19_p5) target bundleno = 4 (0x4), region = 101 }
 0xce4   : > { %s2348_s13 = smov %s2343_s19 }
 0xce8   :  { %1398 = vsyncpa [#allocation6], 1 }
 0xce9   :  { %1400 = vsyncpa [#allocation6 + $0x1], 1 }

</bundles_post_ra>
